<compile_context>
chip_gen: v6e
topology: v6e:2x2x1
jax: 0.10.0
libtpu: 0.0.40
codegen_flags: <defaults>
</compile_context>

<pallas_src>
import jax
import jax.numpy as jnp
from jax.experimental import pallas as pl
from jax.experimental.pallas import tpu as pltpu

# Problem sizes (static, baked into the kernel).
B = 8        # batch size
T = 8        # trajectory length (number of actions)
T1 = T + 1   # number of states per trajectory
S = 16       # state size
A = 4        # action size
L = 32       # latent size
C = L + S    # combined [latent | state] width = 48
ALPHA = 0.1

# Parameter-slab row offsets (all multiples of 8 -> sublane-aligned in-kernel slices).
_W_ENC_R = 0      # (S, L)  rows   0:16
_B_ENC_R = 16     # (1, L)  row    16
_W_DEC_R = 24     # (L, S)  rows  24:56   (stored in lanes 0:S)
_B_DEC_R = 56     # (1, S)  row    56     (lanes 0:S)
_W_DZ_R = 64      # (L, L)  rows  64:96
_W_DA_R = 96      # (A, L)  rows  96:100
_B_DYN_R = 104    # (1, L)  row   104
P_ROWS = 112


def pack_params(params):
    """One-time setup: pack the 7 parameter tensors into a single (112, 32) f32 slab."""
    slab = jnp.zeros((P_ROWS, L), jnp.float32)
    slab = slab.at[_W_ENC_R:_W_ENC_R + S, :].set(params["w_enc"])
    slab = slab.at[_B_ENC_R:_B_ENC_R + 1, :].set(params["b_enc"])
    slab = slab.at[_W_DEC_R:_W_DEC_R + L, :S].set(params["w_dec"])
    slab = slab.at[_B_DEC_R:_B_DEC_R + 1, :S].set(params["b_dec"])
    slab = slab.at[_W_DZ_R:_W_DZ_R + L, :].set(params["w_dz"])
    slab = slab.at[_W_DA_R:_W_DA_R + A, :].set(params["w_da"])
    slab = slab.at[_B_DYN_R:_B_DYN_R + 1, :].set(params["b_dyn"])
    return slab


def multi_step_loss_kernel(states_ref, actions_ref, p_ref, out_ref):
    f32 = jnp.float32
    dot = lambda a, b: jnp.dot(a, b, preferred_element_type=f32)

    # ---- unpack parameters from the single packed slab (aligned static slices) ----
    w_enc = p_ref[_W_ENC_R:_W_ENC_R + S, :]          # (S, L)
    b_enc = p_ref[_B_ENC_R:_B_ENC_R + 1, :]          # (1, L)
    w_dec = p_ref[_W_DEC_R:_W_DEC_R + L, 0:S]        # (L, S)
    b_dec = p_ref[_B_DEC_R:_B_DEC_R + 1, 0:S]        # (1, S)
    w_dz = p_ref[_W_DZ_R:_W_DZ_R + L, :]             # (L, L)
    w_da = p_ref[_W_DA_R:_W_DA_R + A, :]             # (A, L)
    b_dyn = p_ref[_B_DYN_R:_B_DYN_R + 1, :]          # (1, L)

    # ---- in-kernel time-major repack of the untouched 3-D inputs ----
    # rows [t*B:(t+1)*B) of *_stack hold timestep t; every later slice is 8-row aligned.
    s_stack = jnp.concatenate([states_ref[:, t, :] for t in range(T1)], axis=0)   # (T1*B, S)
    a_stack = jnp.concatenate([actions_ref[:, t, :] for t in range(T)], axis=0)   # (T*B,  A)

    # ---- reconstruction branch (independent of the rollout chain) ----
    z_stack = dot(s_stack, w_enc) + b_enc            # encode(all states)   (T1*B, L)
    rec_err = dot(z_stack, w_dec) + b_dec - s_stack  # decode(z) - states   (T1*B, S)

    # ---- precomposed one-step affine maps ----
    # model(s, a) = decode(latent_dyn(encode(s), a)) = s @ w_ss + a @ w_as + b_s
    w_ss = dot(dot(w_enc, w_dz), w_dec)              # (S, S)
    w_as = dot(w_da, w_dec)                          # (A, S)
    b_s = dot(dot(b_enc, w_dz) + b_dyn, w_dec) + b_dec   # (1, S)

    # ---- combined latent|state recurrence  x_{t+1} = x_t @ W + c_t,  x = [z | s] ----
    w_comb = jnp.concatenate(
        [jnp.concatenate([w_dz, jnp.zeros((L, S), f32)], axis=1),
         jnp.concatenate([jnp.zeros((S, L), f32), w_ss], axis=1)], axis=0)       # (C, C)
    w_comb2 = dot(w_comb, w_comb)                    # advances two timesteps per dot
    w_ac = jnp.concatenate([w_da, w_as], axis=1)     # (A, C)
    b_c = jnp.concatenate([b_dyn, b_s], axis=1)      # (1, C)

    # All per-step additive terms from ONE batched matmul (off the serial chain).
    c_stack = dot(a_stack, w_ac) + b_c               # (T*B, C)
    half = T // 2
    c_even = jnp.concatenate(
        [c_stack[2 * k * B:(2 * k + 1) * B, :] for k in range(half)], axis=0)    # c0,c2,c4,c6
    c_odd = jnp.concatenate(
        [c_stack[(2 * k + 1) * B:(2 * k + 2) * B, :] for k in range(half)], axis=0)
    # Pair-merged terms e_k = c_{2k} @ W + c_{2k+1} (one batched matmul).
    e_stack = dot(c_even, w_comb) + c_odd            # (half*B, C)

    # x_0 = [encode(states[:, 0]) | states[:, 0]]
    x0 = jnp.concatenate([z_stack[0:B, :], s_stack[0:B, :]], axis=1)             # (B, C)

    # Stride-2 chain: only T//2 = 4 serially dependent MXU dots.
    x_even = [x0]
    for k in range(half):
        x_even.append(dot(x_even[-1], w_comb2) + e_stack[k * B:(k + 1) * B, :])
    # x_even = [x0, x2, x4, x6, x8]

    # Odd-index states recovered with one batched matmul: x_{2k+1} = x_{2k} @ W + c_{2k}.
    x_even_stack = jnp.concatenate(x_even[:half], axis=0)                        # [x0;x2;x4;x6]
    x_odd_stack = dot(x_even_stack, w_comb) + c_even                             # [x1;x3;x5;x7]

    # ---- weighted squared-error accumulation; single reduction at the very end ----
    acc = jnp.zeros((B, C), f32)
    for k in range(T):
        # prediction x_{k+1}; target [encode(states[:, k]) | states[:, k+1]]
        if k % 2 == 0:
            pred = x_odd_stack[(k // 2) * B:(k // 2 + 1) * B, :]
        else:
            pred = x_even[(k + 1) // 2]
        tgt = jnp.concatenate([z_stack[k * B:(k + 1) * B, :],
                               s_stack[(k + 1) * B:(k + 2) * B, :]], axis=1)
        d = pred - tgt
        acc = acc + d * d

    rec_sq = rec_err * rec_err
    rec_acc = jnp.zeros((B, S), f32)
    for t in range(T1):
        rec_acc = rec_acc + rec_sq[t * B:(t + 1) * B, :]

    # Fold the three MSE normalizations (+ alpha) into lane weights -> one reduction tree.
    w_lane = jnp.concatenate(
        [jnp.full((1, L), ALPHA / float(T * B * L), f32),
         jnp.full((1, S), 1.0 / float(T * B * S), f32)], axis=1)                 # (1, C)
    rec_w = 1.0 / float(T1 * B * S)
    total = jnp.sum(jnp.concatenate([acc * w_lane, rec_acc * rec_w], axis=1))
    out_ref[...] = jnp.reshape(total, (1, 1))


@jax.jit
def multi_step_loss(states, actions, packed_params):
    # No wrapper-side transpose/reshape: states/actions enter as-is (one DMA each) and the
    # parameters as one pre-packed slab -> 3 input DMAs total.
    # NOTE: single grid point; for much larger batch / trajectory counts, add a leading
    # batch grid axis with dimension_semantics=("parallel",) so v7x's 2nd TensorCore helps.
    vmem = pl.BlockSpec(memory_space=pltpu.MemorySpace.VMEM)
    out = pl.pallas_call(
        multi_step_loss_kernel,
        out_shape=jax.ShapeDtypeStruct((1, 1), jnp.float32),
        in_specs=[vmem, vmem, vmem],
        out_specs=vmem,
    )(states, actions, packed_params)
    return out[0, 0]


def reference_loss(states, actions, params):
    """Pure-JAX reference mirroring the PyTorch MultiStepLoss.forward."""
    encode = lambda x: x @ params["w_enc"] + params["b_enc"]
    decode = lambda z: z @ params["w_dec"] + params["b_dec"]
    latent_dyn = lambda z, a: z @ params["w_dz"] + a @ params["w_da"] + params["b_dyn"]
    model_fwd = lambda s, a: decode(latent_dyn(encode(s), a))
    mse = lambda a, b: jnp.mean((a - b) ** 2)

    z_all = encode(states)                                 # (B, T1, L)
    rec_loss = mse(decode(z_all), states)
    prev_z, prev_s = z_all[:, 0, :], states[:, 0, :]
    pred_zs, pred_states = [], []
    for t in range(T):
        a_t = actions[:, t]
        prev_z = latent_dyn(prev_z, a_t); pred_zs.append(prev_z)
        prev_s = model_fwd(prev_s, a_t); pred_states.append(prev_s)
    pred_states = jnp.stack(pred_states, axis=1)
    pred_zs = jnp.stack(pred_zs, axis=1)
    pred_loss = mse(pred_states, states[:, 1:])
    lat_loss = mse(pred_zs, z_all[:, :-1])                 # encode(states[:, :-1])
    return rec_loss + pred_loss + ALPHA * lat_loss


if __name__ == "__main__":
    key = jax.random.PRNGKey(0)
    ks = jax.random.split(key, 9)
    states = jax.random.normal(ks[0], (B, T1, S), jnp.float32)
    actions = jax.random.normal(ks[1], (B, T, A), jnp.float32)
    scale = jnp.float32(0.1)
    params = dict(
        w_enc=scale * jax.random.normal(ks[2], (S, L), jnp.float32),
        b_enc=scale * jax.random.normal(ks[3], (1, L), jnp.float32),
        w_dec=scale * jax.random.normal(ks[4], (L, S), jnp.float32),
        b_dec=scale * jax.random.normal(ks[5], (1, S), jnp.float32),
        w_dz=scale * jax.random.normal(ks[6], (L, L), jnp.float32),
        w_da=scale * jax.random.normal(ks[7], (A, L), jnp.float32),
        b_dyn=scale * jax.random.normal(ks[8], (1, L), jnp.float32),
    )
    packed = pack_params(params)   # one-time setup, outside the jitted loss

    loss = multi_step_loss(states, actions, packed)
    loss = jax.block_until_ready(loss)
    ref = reference_loss(states, actions, params)
    assert bool(jnp.isfinite(loss)), "non-finite loss"
    assert bool(jnp.allclose(loss, ref, rtol=1e-4, atol=1e-5)), (loss, ref)
    print("KERNEL_OK")
</pallas_src>

<mosaic_0001>
module attributes {stable_mosaic.version = 11 : i64} {
  func.func @multi_step_loss_kernel(%arg0: memref<8x9x16xf32, #tpu.memory_space<vmem>>, %arg1: memref<8x8x4xf32, #tpu.memory_space<vmem>>, %arg2: memref<112x32xf32, #tpu.memory_space<vmem>>, %arg3: memref<1x1xf32, #tpu.memory_space<vmem>>) attributes {dimension_semantics = [], scalar_prefetch = 0 : i64, scratch_operands = 0 : i64, tpu.core_type = #tpu.core_type<tc>} {
    %c0 = arith.constant 0 : index
    %c0_0 = arith.constant 0 : index
    %0 = vector.load %arg2[%c0, %c0_0] : memref<112x32xf32, #tpu.memory_space<vmem>>, vector<16x32xf32>
    %c16 = arith.constant 16 : index
    %c0_1 = arith.constant 0 : index
    %1 = vector.load %arg2[%c16, %c0_1] : memref<112x32xf32, #tpu.memory_space<vmem>>, vector<1x32xf32>
    %c24 = arith.constant 24 : index
    %c0_2 = arith.constant 0 : index
    %2 = vector.load %arg2[%c24, %c0_2] : memref<112x32xf32, #tpu.memory_space<vmem>>, vector<32x16xf32>
    %c56 = arith.constant 56 : index
    %c0_3 = arith.constant 0 : index
    %3 = vector.load %arg2[%c56, %c0_3] : memref<112x32xf32, #tpu.memory_space<vmem>>, vector<1x16xf32>
    %c64 = arith.constant 64 : index
    %c0_4 = arith.constant 0 : index
    %4 = vector.load %arg2[%c64, %c0_4] : memref<112x32xf32, #tpu.memory_space<vmem>>, vector<32x32xf32>
    %c96 = arith.constant 96 : index
    %c0_5 = arith.constant 0 : index
    %5 = vector.load %arg2[%c96, %c0_5] : memref<112x32xf32, #tpu.memory_space<vmem>>, vector<4x32xf32>
    %c104 = arith.constant 104 : index
    %c0_6 = arith.constant 0 : index
    %6 = vector.load %arg2[%c104, %c0_6] : memref<112x32xf32, #tpu.memory_space<vmem>>, vector<1x32xf32>
    %c0_7 = arith.constant 0 : index
    %c0_8 = arith.constant 0 : index
    %c0_9 = arith.constant 0 : index
    %7 = vector.load %arg0[%c0_7, %c0_8, %c0_9] : memref<8x9x16xf32, #tpu.memory_space<vmem>>, vector<8x1x16xf32>
    %8 = vector.shape_cast %7 : vector<8x1x16xf32> to vector<8x16xf32>
    %c0_10 = arith.constant 0 : index
    %c1 = arith.constant 1 : index
    %c0_11 = arith.constant 0 : index
    %9 = vector.load %arg0[%c0_10, %c1, %c0_11] : memref<8x9x16xf32, #tpu.memory_space<vmem>>, vector<8x1x16xf32>
    %10 = vector.shape_cast %9 : vector<8x1x16xf32> to vector<8x16xf32>
    %c0_12 = arith.constant 0 : index
    %c2 = arith.constant 2 : index
    %c0_13 = arith.constant 0 : index
    %11 = vector.load %arg0[%c0_12, %c2, %c0_13] : memref<8x9x16xf32, #tpu.memory_space<vmem>>, vector<8x1x16xf32>
    %12 = vector.shape_cast %11 : vector<8x1x16xf32> to vector<8x16xf32>
    %c0_14 = arith.constant 0 : index
    %c3 = arith.constant 3 : index
    %c0_15 = arith.constant 0 : index
    %13 = vector.load %arg0[%c0_14, %c3, %c0_15] : memref<8x9x16xf32, #tpu.memory_space<vmem>>, vector<8x1x16xf32>
    %14 = vector.shape_cast %13 : vector<8x1x16xf32> to vector<8x16xf32>
    %c0_16 = arith.constant 0 : index
    %c4 = arith.constant 4 : index
    %c0_17 = arith.constant 0 : index
    %15 = vector.load %arg0[%c0_16, %c4, %c0_17] : memref<8x9x16xf32, #tpu.memory_space<vmem>>, vector<8x1x16xf32>
    %16 = vector.shape_cast %15 : vector<8x1x16xf32> to vector<8x16xf32>
    %c0_18 = arith.constant 0 : index
    %c5 = arith.constant 5 : index
    %c0_19 = arith.constant 0 : index
    %17 = vector.load %arg0[%c0_18, %c5, %c0_19] : memref<8x9x16xf32, #tpu.memory_space<vmem>>, vector<8x1x16xf32>
    %18 = vector.shape_cast %17 : vector<8x1x16xf32> to vector<8x16xf32>
    %c0_20 = arith.constant 0 : index
    %c6 = arith.constant 6 : index
    %c0_21 = arith.constant 0 : index
    %19 = vector.load %arg0[%c0_20, %c6, %c0_21] : memref<8x9x16xf32, #tpu.memory_space<vmem>>, vector<8x1x16xf32>
    %20 = vector.shape_cast %19 : vector<8x1x16xf32> to vector<8x16xf32>
    %c0_22 = arith.constant 0 : index
    %c7 = arith.constant 7 : index
    %c0_23 = arith.constant 0 : index
    %21 = vector.load %arg0[%c0_22, %c7, %c0_23] : memref<8x9x16xf32, #tpu.memory_space<vmem>>, vector<8x1x16xf32>
    %22 = vector.shape_cast %21 : vector<8x1x16xf32> to vector<8x16xf32>
    %c0_24 = arith.constant 0 : index
    %c8 = arith.constant 8 : index
    %c0_25 = arith.constant 0 : index
    %23 = vector.load %arg0[%c0_24, %c8, %c0_25] : memref<8x9x16xf32, #tpu.memory_space<vmem>>, vector<8x1x16xf32>
    %24 = vector.shape_cast %23 : vector<8x1x16xf32> to vector<8x16xf32>
    %25 = tpu.concatenate %8, %10, %12, %14, %16, %18, %20, %22, %24 in 0 : vector<8x16xf32>, vector<8x16xf32>, vector<8x16xf32>, vector<8x16xf32>, vector<8x16xf32>, vector<8x16xf32>, vector<8x16xf32>, vector<8x16xf32>, vector<8x16xf32> -> vector<72x16xf32>
    %c0_26 = arith.constant 0 : index
    %c0_27 = arith.constant 0 : index
    %c0_28 = arith.constant 0 : index
    %26 = vector.load %arg1[%c0_26, %c0_27, %c0_28] : memref<8x8x4xf32, #tpu.memory_space<vmem>>, vector<8x1x4xf32>
    %27 = vector.shape_cast %26 : vector<8x1x4xf32> to vector<8x4xf32>
    %c0_29 = arith.constant 0 : index
    %c1_30 = arith.constant 1 : index
    %c0_31 = arith.constant 0 : index
    %28 = vector.load %arg1[%c0_29, %c1_30, %c0_31] : memref<8x8x4xf32, #tpu.memory_space<vmem>>, vector<8x1x4xf32>
    %29 = vector.shape_cast %28 : vector<8x1x4xf32> to vector<8x4xf32>
    %c0_32 = arith.constant 0 : index
    %c2_33 = arith.constant 2 : index
    %c0_34 = arith.constant 0 : index
    %30 = vector.load %arg1[%c0_32, %c2_33, %c0_34] : memref<8x8x4xf32, #tpu.memory_space<vmem>>, vector<8x1x4xf32>
    %31 = vector.shape_cast %30 : vector<8x1x4xf32> to vector<8x4xf32>
    %c0_35 = arith.constant 0 : index
    %c3_36 = arith.constant 3 : index
    %c0_37 = arith.constant 0 : index
    %32 = vector.load %arg1[%c0_35, %c3_36, %c0_37] : memref<8x8x4xf32, #tpu.memory_space<vmem>>, vector<8x1x4xf32>
    %33 = vector.shape_cast %32 : vector<8x1x4xf32> to vector<8x4xf32>
    %c0_38 = arith.constant 0 : index
    %c4_39 = arith.constant 4 : index
    %c0_40 = arith.constant 0 : index
    %34 = vector.load %arg1[%c0_38, %c4_39, %c0_40] : memref<8x8x4xf32, #tpu.memory_space<vmem>>, vector<8x1x4xf32>
    %35 = vector.shape_cast %34 : vector<8x1x4xf32> to vector<8x4xf32>
    %c0_41 = arith.constant 0 : index
    %c5_42 = arith.constant 5 : index
    %c0_43 = arith.constant 0 : index
    %36 = vector.load %arg1[%c0_41, %c5_42, %c0_43] : memref<8x8x4xf32, #tpu.memory_space<vmem>>, vector<8x1x4xf32>
    %37 = vector.shape_cast %36 : vector<8x1x4xf32> to vector<8x4xf32>
    %c0_44 = arith.constant 0 : index
    %c6_45 = arith.constant 6 : index
    %c0_46 = arith.constant 0 : index
    %38 = vector.load %arg1[%c0_44, %c6_45, %c0_46] : memref<8x8x4xf32, #tpu.memory_space<vmem>>, vector<8x1x4xf32>
    %39 = vector.shape_cast %38 : vector<8x1x4xf32> to vector<8x4xf32>
    %c0_47 = arith.constant 0 : index
    %c7_48 = arith.constant 7 : index
    %c0_49 = arith.constant 0 : index
    %40 = vector.load %arg1[%c0_47, %c7_48, %c0_49] : memref<8x8x4xf32, #tpu.memory_space<vmem>>, vector<8x1x4xf32>
    %41 = vector.shape_cast %40 : vector<8x1x4xf32> to vector<8x4xf32>
    %42 = tpu.concatenate %27, %29, %31, %33, %35, %37, %39, %41 in 0 : vector<8x4xf32>, vector<8x4xf32>, vector<8x4xf32>, vector<8x4xf32>, vector<8x4xf32>, vector<8x4xf32>, vector<8x4xf32>, vector<8x4xf32> -> vector<64x4xf32>
    %cst = arith.constant dense<0.000000e+00> : vector<72x32xf32>
    %43 = tpu.matmul %25, %0, %cst {dimension_numbers = #tpu.dot_dimension_numbers<[1], [0], [0], [1], [0, 0, 1, 1], [], []>} : vector<72x16xf32>, vector<16x32xf32>, vector<72x32xf32> -> vector<72x32xf32>
    %44 = vector.broadcast %1 : vector<1x32xf32> to vector<72x32xf32>
    %45 = arith.addf %43, %44 : vector<72x32xf32>
    %cst_50 = arith.constant dense<0.000000e+00> : vector<72x16xf32>
    %46 = tpu.matmul %45, %2, %cst_50 {dimension_numbers = #tpu.dot_dimension_numbers<[1], [0], [0], [1], [0, 0, 1, 1], [], []>} : vector<72x32xf32>, vector<32x16xf32>, vector<72x16xf32> -> vector<72x16xf32>
    %47 = vector.broadcast %3 : vector<1x16xf32> to vector<72x16xf32>
    %48 = arith.addf %46, %47 : vector<72x16xf32>
    %49 = arith.subf %48, %25 : vector<72x16xf32>
    %cst_51 = arith.constant dense<0.000000e+00> : vector<16x32xf32>
    %50 = tpu.matmul %0, %4, %cst_51 {dimension_numbers = #tpu.dot_dimension_numbers<[1], [0], [0], [1], [0, 0, 1, 1], [], []>} : vector<16x32xf32>, vector<32x32xf32>, vector<16x32xf32> -> vector<16x32xf32>
    %cst_52 = arith.constant dense<0.000000e+00> : vector<16x16xf32>
    %51 = tpu.matmul %50, %2, %cst_52 {dimension_numbers = #tpu.dot_dimension_numbers<[1], [0], [0], [1], [0, 0, 1, 1], [], []>} : vector<16x32xf32>, vector<32x16xf32>, vector<16x16xf32> -> vector<16x16xf32>
    %cst_53 = arith.constant dense<0.000000e+00> : vector<4x16xf32>
    %52 = tpu.matmul %5, %2, %cst_53 {dimension_numbers = #tpu.dot_dimension_numbers<[1], [0], [0], [1], [0, 0, 1, 1], [], []>} : vector<4x32xf32>, vector<32x16xf32>, vector<4x16xf32> -> vector<4x16xf32>
    %cst_54 = arith.constant dense<0.000000e+00> : vector<1x32xf32>
    %53 = tpu.matmul %1, %4, %cst_54 {dimension_numbers = #tpu.dot_dimension_numbers<[1], [0], [0], [1], [0, 0, 1, 1], [], []>} : vector<1x32xf32>, vector<32x32xf32>, vector<1x32xf32> -> vector<1x32xf32>
    %54 = arith.addf %53, %6 : vector<1x32xf32>
    %cst_55 = arith.constant dense<0.000000e+00> : vector<1x16xf32>
    %55 = tpu.matmul %54, %2, %cst_55 {dimension_numbers = #tpu.dot_dimension_numbers<[1], [0], [0], [1], [0, 0, 1, 1], [], []>} : vector<1x32xf32>, vector<32x16xf32>, vector<1x16xf32> -> vector<1x16xf32>
    %56 = arith.addf %55, %3 : vector<1x16xf32>
    %cst_56 = arith.constant 0.000000e+00 : f32
    %57 = vector.broadcast %cst_56 : f32 to vector<32x16xf32>
    %58 = tpu.concatenate %4, %57 in 1 : vector<32x32xf32>, vector<32x16xf32> -> vector<32x48xf32>
    %cst_57 = arith.constant 0.000000e+00 : f32
    %59 = vector.broadcast %cst_57 : f32 to vector<16x32xf32>
    %60 = tpu.concatenate %59, %51 in 1 : vector<16x32xf32>, vector<16x16xf32> -> vector<16x48xf32>
    %61 = tpu.concatenate %58, %60 in 0 : vector<32x48xf32>, vector<16x48xf32> -> vector<48x48xf32>
    %cst_58 = arith.constant dense<0.000000e+00> : vector<48x48xf32>
    %62 = tpu.matmul %61, %61, %cst_58 {dimension_numbers = #tpu.dot_dimension_numbers<[1], [0], [0], [1], [0, 0, 1, 1], [], []>} : vector<48x48xf32>, vector<48x48xf32>, vector<48x48xf32> -> vector<48x48xf32>
    %63 = tpu.concatenate %5, %52 in 1 : vector<4x32xf32>, vector<4x16xf32> -> vector<4x48xf32>
    %64 = tpu.concatenate %6, %56 in 1 : vector<1x32xf32>, vector<1x16xf32> -> vector<1x48xf32>
    %cst_59 = arith.constant dense<0.000000e+00> : vector<64x48xf32>
    %65 = tpu.matmul %42, %63, %cst_59 {dimension_numbers = #tpu.dot_dimension_numbers<[1], [0], [0], [1], [0, 0, 1, 1], [], []>} : vector<64x4xf32>, vector<4x48xf32>, vector<64x48xf32> -> vector<64x48xf32>
    %66 = vector.broadcast %64 : vector<1x48xf32> to vector<64x48xf32>
    %67 = arith.addf %65, %66 : vector<64x48xf32>
    %68 = vector.extract_strided_slice %67 {offsets = [0, 0], sizes = [8, 48], strides = [1, 1]} : vector<64x48xf32> to vector<8x48xf32>
    %69 = vector.extract_strided_slice %67 {offsets = [16, 0], sizes = [8, 48], strides = [1, 1]} : vector<64x48xf32> to vector<8x48xf32>
    %70 = vector.extract_strided_slice %67 {offsets = [32, 0], sizes = [8, 48], strides = [1, 1]} : vector<64x48xf32> to vector<8x48xf32>
    %71 = vector.extract_strided_slice %67 {offsets = [48, 0], sizes = [8, 48], strides = [1, 1]} : vector<64x48xf32> to vector<8x48xf32>
    %72 = tpu.concatenate %68, %69, %70, %71 in 0 : vector<8x48xf32>, vector<8x48xf32>, vector<8x48xf32>, vector<8x48xf32> -> vector<32x48xf32>
    %73 = vector.extract_strided_slice %67 {offsets = [8, 0], sizes = [8, 48], strides = [1, 1]} : vector<64x48xf32> to vector<8x48xf32>
    %74 = vector.extract_strided_slice %67 {offsets = [24, 0], sizes = [8, 48], strides = [1, 1]} : vector<64x48xf32> to vector<8x48xf32>
    %75 = vector.extract_strided_slice %67 {offsets = [40, 0], sizes = [8, 48], strides = [1, 1]} : vector<64x48xf32> to vector<8x48xf32>
    %76 = vector.extract_strided_slice %67 {offsets = [56, 0], sizes = [8, 48], strides = [1, 1]} : vector<64x48xf32> to vector<8x48xf32>
    %77 = tpu.concatenate %73, %74, %75, %76 in 0 : vector<8x48xf32>, vector<8x48xf32>, vector<8x48xf32>, vector<8x48xf32> -> vector<32x48xf32>
    %cst_60 = arith.constant dense<0.000000e+00> : vector<32x48xf32>
    %78 = tpu.matmul %72, %61, %cst_60 {dimension_numbers = #tpu.dot_dimension_numbers<[1], [0], [0], [1], [0, 0, 1, 1], [], []>} : vector<32x48xf32>, vector<48x48xf32>, vector<32x48xf32> -> vector<32x48xf32>
    %79 = arith.addf %78, %77 : vector<32x48xf32>
    %80 = vector.extract_strided_slice %45 {offsets = [0, 0], sizes = [8, 32], strides = [1, 1]} : vector<72x32xf32> to vector<8x32xf32>
    %81 = vector.extract_strided_slice %25 {offsets = [0, 0], sizes = [8, 16], strides = [1, 1]} : vector<72x16xf32> to vector<8x16xf32>
    %82 = tpu.concatenate %80, %81 in 1 : vector<8x32xf32>, vector<8x16xf32> -> vector<8x48xf32>
    %cst_61 = arith.constant dense<0.000000e+00> : vector<8x48xf32>
    %83 = tpu.matmul %82, %62, %cst_61 {dimension_numbers = #tpu.dot_dimension_numbers<[1], [0], [0], [1], [0, 0, 1, 1], [], []>} : vector<8x48xf32>, vector<48x48xf32>, vector<8x48xf32> -> vector<8x48xf32>
    %84 = vector.extract_strided_slice %79 {offsets = [0, 0], sizes = [8, 48], strides = [1, 1]} : vector<32x48xf32> to vector<8x48xf32>
    %85 = arith.addf %83, %84 : vector<8x48xf32>
    %cst_62 = arith.constant dense<0.000000e+00> : vector<8x48xf32>
    %86 = tpu.matmul %85, %62, %cst_62 {dimension_numbers = #tpu.dot_dimension_numbers<[1], [0], [0], [1], [0, 0, 1, 1], [], []>} : vector<8x48xf32>, vector<48x48xf32>, vector<8x48xf32> -> vector<8x48xf32>
    %87 = vector.extract_strided_slice %79 {offsets = [8, 0], sizes = [8, 48], strides = [1, 1]} : vector<32x48xf32> to vector<8x48xf32>
    %88 = arith.addf %86, %87 : vector<8x48xf32>
    %cst_63 = arith.constant dense<0.000000e+00> : vector<8x48xf32>
    %89 = tpu.matmul %88, %62, %cst_63 {dimension_numbers = #tpu.dot_dimension_numbers<[1], [0], [0], [1], [0, 0, 1, 1], [], []>} : vector<8x48xf32>, vector<48x48xf32>, vector<8x48xf32> -> vector<8x48xf32>
    %90 = vector.extract_strided_slice %79 {offsets = [16, 0], sizes = [8, 48], strides = [1, 1]} : vector<32x48xf32> to vector<8x48xf32>
    %91 = arith.addf %89, %90 : vector<8x48xf32>
    %cst_64 = arith.constant dense<0.000000e+00> : vector<8x48xf32>
    %92 = tpu.matmul %91, %62, %cst_64 {dimension_numbers = #tpu.dot_dimension_numbers<[1], [0], [0], [1], [0, 0, 1, 1], [], []>} : vector<8x48xf32>, vector<48x48xf32>, vector<8x48xf32> -> vector<8x48xf32>
    %93 = vector.extract_strided_slice %79 {offsets = [24, 0], sizes = [8, 48], strides = [1, 1]} : vector<32x48xf32> to vector<8x48xf32>
    %94 = arith.addf %92, %93 : vector<8x48xf32>
    %95 = tpu.concatenate %82, %85, %88, %91 in 0 : vector<8x48xf32>, vector<8x48xf32>, vector<8x48xf32>, vector<8x48xf32> -> vector<32x48xf32>
    %cst_65 = arith.constant dense<0.000000e+00> : vector<32x48xf32>
    %96 = tpu.matmul %95, %61, %cst_65 {dimension_numbers = #tpu.dot_dimension_numbers<[1], [0], [0], [1], [0, 0, 1, 1], [], []>} : vector<32x48xf32>, vector<48x48xf32>, vector<32x48xf32> -> vector<32x48xf32>
    %97 = arith.addf %96, %72 : vector<32x48xf32>
    %cst_66 = arith.constant 0.000000e+00 : f32
    %98 = vector.broadcast %cst_66 : f32 to vector<8x48xf32>
    %99 = vector.extract_strided_slice %97 {offsets = [0, 0], sizes = [8, 48], strides = [1, 1]} : vector<32x48xf32> to vector<8x48xf32>
    %100 = vector.extract_strided_slice %45 {offsets = [0, 0], sizes = [8, 32], strides = [1, 1]} : vector<72x32xf32> to vector<8x32xf32>
    %101 = vector.extract_strided_slice %25 {offsets = [8, 0], sizes = [8, 16], strides = [1, 1]} : vector<72x16xf32> to vector<8x16xf32>
    %102 = tpu.concatenate %100, %101 in 1 : vector<8x32xf32>, vector<8x16xf32> -> vector<8x48xf32>
    %103 = arith.subf %99, %102 : vector<8x48xf32>
    %104 = arith.mulf %103, %103 : vector<8x48xf32>
    %105 = arith.addf %98, %104 : vector<8x48xf32>
    %106 = vector.extract_strided_slice %45 {offsets = [8, 0], sizes = [8, 32], strides = [1, 1]} : vector<72x32xf32> to vector<8x32xf32>
    %107 = vector.extract_strided_slice %25 {offsets = [16, 0], sizes = [8, 16], strides = [1, 1]} : vector<72x16xf32> to vector<8x16xf32>
    %108 = tpu.concatenate %106, %107 in 1 : vector<8x32xf32>, vector<8x16xf32> -> vector<8x48xf32>
    %109 = arith.subf %85, %108 : vector<8x48xf32>
    %110 = arith.mulf %109, %109 : vector<8x48xf32>
    %111 = arith.addf %105, %110 : vector<8x48xf32>
    %112 = vector.extract_strided_slice %97 {offsets = [8, 0], sizes = [8, 48], strides = [1, 1]} : vector<32x48xf32> to vector<8x48xf32>
    %113 = vector.extract_strided_slice %45 {offsets = [16, 0], sizes = [8, 32], strides = [1, 1]} : vector<72x32xf32> to vector<8x32xf32>
    %114 = vector.extract_strided_slice %25 {offsets = [24, 0], sizes = [8, 16], strides = [1, 1]} : vector<72x16xf32> to vector<8x16xf32>
    %115 = tpu.concatenate %113, %114 in 1 : vector<8x32xf32>, vector<8x16xf32> -> vector<8x48xf32>
    %116 = arith.subf %112, %115 : vector<8x48xf32>
    %117 = arith.mulf %116, %116 : vector<8x48xf32>
    %118 = arith.addf %111, %117 : vector<8x48xf32>
    %119 = vector.extract_strided_slice %45 {offsets = [24, 0], sizes = [8, 32], strides = [1, 1]} : vector<72x32xf32> to vector<8x32xf32>
    %120 = vector.extract_strided_slice %25 {offsets = [32, 0], sizes = [8, 16], strides = [1, 1]} : vector<72x16xf32> to vector<8x16xf32>
    %121 = tpu.concatenate %119, %120 in 1 : vector<8x32xf32>, vector<8x16xf32> -> vector<8x48xf32>
    %122 = arith.subf %88, %121 : vector<8x48xf32>
    %123 = arith.mulf %122, %122 : vector<8x48xf32>
    %124 = arith.addf %118, %123 : vector<8x48xf32>
    %125 = vector.extract_strided_slice %97 {offsets = [16, 0], sizes = [8, 48], strides = [1, 1]} : vector<32x48xf32> to vector<8x48xf32>
    %126 = vector.extract_strided_slice %45 {offsets = [32, 0], sizes = [8, 32], strides = [1, 1]} : vector<72x32xf32> to vector<8x32xf32>
    %127 = vector.extract_strided_slice %25 {offsets = [40, 0], sizes = [8, 16], strides = [1, 1]} : vector<72x16xf32> to vector<8x16xf32>
    %128 = tpu.concatenate %126, %127 in 1 : vector<8x32xf32>, vector<8x16xf32> -> vector<8x48xf32>
    %129 = arith.subf %125, %128 : vector<8x48xf32>
    %130 = arith.mulf %129, %129 : vector<8x48xf32>
    %131 = arith.addf %124, %130 : vector<8x48xf32>
    %132 = vector.extract_strided_slice %45 {offsets = [40, 0], sizes = [8, 32], strides = [1, 1]} : vector<72x32xf32> to vector<8x32xf32>
    %133 = vector.extract_strided_slice %25 {offsets = [48, 0], sizes = [8, 16], strides = [1, 1]} : vector<72x16xf32> to vector<8x16xf32>
    %134 = tpu.concatenate %132, %133 in 1 : vector<8x32xf32>, vector<8x16xf32> -> vector<8x48xf32>
    %135 = arith.subf %91, %134 : vector<8x48xf32>
    %136 = arith.mulf %135, %135 : vector<8x48xf32>
    %137 = arith.addf %131, %136 : vector<8x48xf32>
    %138 = vector.extract_strided_slice %97 {offsets = [24, 0], sizes = [8, 48], strides = [1, 1]} : vector<32x48xf32> to vector<8x48xf32>
    %139 = vector.extract_strided_slice %45 {offsets = [48, 0], sizes = [8, 32], strides = [1, 1]} : vector<72x32xf32> to vector<8x32xf32>
    %140 = vector.extract_strided_slice %25 {offsets = [56, 0], sizes = [8, 16], strides = [1, 1]} : vector<72x16xf32> to vector<8x16xf32>
    %141 = tpu.concatenate %139, %140 in 1 : vector<8x32xf32>, vector<8x16xf32> -> vector<8x48xf32>
    %142 = arith.subf %138, %141 : vector<8x48xf32>
    %143 = arith.mulf %142, %142 : vector<8x48xf32>
    %144 = arith.addf %137, %143 : vector<8x48xf32>
    %145 = vector.extract_strided_slice %45 {offsets = [56, 0], sizes = [8, 32], strides = [1, 1]} : vector<72x32xf32> to vector<8x32xf32>
    %146 = vector.extract_strided_slice %25 {offsets = [64, 0], sizes = [8, 16], strides = [1, 1]} : vector<72x16xf32> to vector<8x16xf32>
    %147 = tpu.concatenate %145, %146 in 1 : vector<8x32xf32>, vector<8x16xf32> -> vector<8x48xf32>
    %148 = arith.subf %94, %147 : vector<8x48xf32>
    %149 = arith.mulf %148, %148 : vector<8x48xf32>
    %150 = arith.addf %144, %149 : vector<8x48xf32>
    %151 = arith.mulf %49, %49 : vector<72x16xf32>
    %cst_67 = arith.constant 0.000000e+00 : f32
    %152 = vector.broadcast %cst_67 : f32 to vector<8x16xf32>
    %153 = vector.extract_strided_slice %151 {offsets = [0, 0], sizes = [8, 16], strides = [1, 1]} : vector<72x16xf32> to vector<8x16xf32>
    %154 = arith.addf %152, %153 : vector<8x16xf32>
    %155 = vector.extract_strided_slice %151 {offsets = [8, 0], sizes = [8, 16], strides = [1, 1]} : vector<72x16xf32> to vector<8x16xf32>
    %156 = arith.addf %154, %155 : vector<8x16xf32>
    %157 = vector.extract_strided_slice %151 {offsets = [16, 0], sizes = [8, 16], strides = [1, 1]} : vector<72x16xf32> to vector<8x16xf32>
    %158 = arith.addf %156, %157 : vector<8x16xf32>
    %159 = vector.extract_strided_slice %151 {offsets = [24, 0], sizes = [8, 16], strides = [1, 1]} : vector<72x16xf32> to vector<8x16xf32>
    %160 = arith.addf %158, %159 : vector<8x16xf32>
    %161 = vector.extract_strided_slice %151 {offsets = [32, 0], sizes = [8, 16], strides = [1, 1]} : vector<72x16xf32> to vector<8x16xf32>
    %162 = arith.addf %160, %161 : vector<8x16xf32>
    %163 = vector.extract_strided_slice %151 {offsets = [40, 0], sizes = [8, 16], strides = [1, 1]} : vector<72x16xf32> to vector<8x16xf32>
    %164 = arith.addf %162, %163 : vector<8x16xf32>
    %165 = vector.extract_strided_slice %151 {offsets = [48, 0], sizes = [8, 16], strides = [1, 1]} : vector<72x16xf32> to vector<8x16xf32>
    %166 = arith.addf %164, %165 : vector<8x16xf32>
    %167 = vector.extract_strided_slice %151 {offsets = [56, 0], sizes = [8, 16], strides = [1, 1]} : vector<72x16xf32> to vector<8x16xf32>
    %168 = arith.addf %166, %167 : vector<8x16xf32>
    %169 = vector.extract_strided_slice %151 {offsets = [64, 0], sizes = [8, 16], strides = [1, 1]} : vector<72x16xf32> to vector<8x16xf32>
    %170 = arith.addf %168, %169 : vector<8x16xf32>
    %cst_68 = arith.constant 4.88281257E-5 : f32
    %171 = vector.broadcast %cst_68 : f32 to vector<1x32xf32>
    %cst_69 = arith.constant 9.765625E-4 : f32
    %172 = vector.broadcast %cst_69 : f32 to vector<1x16xf32>
    %173 = tpu.concatenate %171, %172 in 1 : vector<1x32xf32>, vector<1x16xf32> -> vector<1x48xf32>
    %174 = vector.broadcast %173 : vector<1x48xf32> to vector<8x48xf32>
    %175 = arith.mulf %150, %174 : vector<8x48xf32>
    %cst_70 = arith.constant 8.68055562E-4 : f32
    %176 = vector.broadcast %cst_70 : f32 to vector<8x16xf32>
    %177 = arith.mulf %170, %176 : vector<8x16xf32>
    %178 = tpu.concatenate %175, %177 in 1 : vector<8x48xf32>, vector<8x16xf32> -> vector<8x64xf32>
    %179 = vector.shape_cast %178 : vector<8x64xf32> to vector<1x8x64xf32>
    %cst_71 = arith.constant dense<0.000000e+00> : vector<1xf32>
    %180 = vector.multi_reduction <add>, %179, %cst_71 [1, 2] : vector<1x8x64xf32> to vector<1xf32>
    %181 = vector.shape_cast %180 : vector<1xf32> to vector<1x1x1xf32>
    %182 = vector.extract %181[0, 0, 0] : f32 from vector<1x1x1xf32>
    %183 = vector.broadcast %182 : f32 to vector<1x1xf32>
    %c0_72 = arith.constant 0 : index
    %c0_73 = arith.constant 0 : index
    %184 = vector.load %arg3[%c0_72, %c0_73] : memref<1x1xf32, #tpu.memory_space<vmem>>, vector<1x1xf32>
    tpu.vector_store %arg3[%c0_72, %c0_73], %183 {strides = array<i32>} : memref<1x1xf32, #tpu.memory_space<vmem>>, vector<1x1xf32>,
    return
  }
}

</mosaic_0001>

<bundles_post_ra>
// kernel: multi_step_loss.1
= control target key start
LH: loop header
LB: loop body
LE: loop exit
PB: predicated region body
PF: predicated region fallthrough
CT: control target
= control target key end

     0   :  { %v2562_v3 = vmov 0.0   ;;  %vm2563_vm0 = vmmov 0   ;;  %vm110_vm1 = vcmask 1041409   ;;  %vm113_vm2 = vcmask 1042434   ;;  %s3718_s0 = inlined_call_operand.vmem [shape: f32[8,9,16], index: 0, kind: input, shape index: {}]   ;;  %s3719_s1 = inlined_call_operand.vmem [shape: f32[8,8,4], index: 1, kind: input, shape index: {}]   ;;  %s3720_s2 = inlined_call_operand.vmem [shape: f32[112,32], index: 2, kind: input, shape index: {}]   ;;  %s3721_s3 = inlined_call_operand.hbm [shape: f32[1,1], index: 3, kind: output, shape index: {}]  }
   0x1   :  { %v2591_v0 = vld [vmem:[%s3720_s2 + $0x8] sm:$0xff]  ;;  %v2596_v1 = vld [vmem:[%s3720_s2] sm:$0xff]  ;;  %2276 = vmatprep.subr.mxu0 %v2562_v3  ;;  %2280 = vmatprep.mubr.msk.f32.mxu0 %vm2563_vm0, %v2562_v3  ;;  %v30_v4 = vld [vmem:[%s3718_s0 + $0x10] sm:$0x1]  ;;  %vm116_vm3 = vcmask 1043459   ;;  %vm119_vm4 = vcmask 1044484  }
   0x2   :  { %v29_v2 = vld [vmem:[%s3718_s0] sm:$0x1]  ;;  %v32_v6 = vld [vmem:[%s3718_s0 + $0x30] sm:$0x1]  ;;  %2277 = vmatpush3.msra.mxu0 %v2591_v0  ;;  %2307 = vmatprep.subr.mxu1 %v2562_v3  ;;  %v109_v11 = vrot.slane %v30_v4, 7  ;;  %v2634_v15 = vld [vmem:[%s3720_s2 + $0x58] sm:$0xff] }
   0x3   :  { %v31_v5 = vld [vmem:[%s3718_s0 + $0x20] sm:$0x1]  ;;  %v34_v8 = vld [vmem:[%s3718_s0 + $0x50] sm:$0x1]  ;;  %2278 = vmatprep.subr.mxu0 %v2562_v3  ;;  %2315 = vmatprep.mubr.msk.f32.mxu1 %vm2563_vm0, %v2562_v3  ;;  %v115_v13 = vrot.slane %v32_v6, 5  ;;  %vm122_vm5 = vcmask 1045509  }
   0x4   :  { %v33_v7 = vld [vmem:[%s3718_s0 + $0x40] sm:$0x1]  ;;  %v36_v10 = vld [vmem:[%s3718_s0 + $0x70] sm:$0x1]  ;;  %v112_v12 = vrot.slane %v31_v5, 6  ;;  %2279 = vmatpush3.msra.mxu0 %v2596_v1  ;;  %v111_v16 = vsel %vm110_vm1, %v109_v11, %v29_v2  ;;  %v121_v17 = vrot.slane %v34_v8, 3 }
   0x5   :  { %v35_v9 = vld [vmem:[%s3718_s0 + $0x60] sm:$0x1]  ;;  %v118_v14 = vrot.slane %v33_v7, 4  ;;  %2342 = vmatprep.subr.mxu0 %v2634_v15  ;;  %v37_v19 = vld [vmem:[%s3718_s0 + $0x1] sm:$0x1]  ;;  %vm125_vm6 = vcmask 1046534  }
   0x6   :  { %v124_v18 = vrot.slane %v35_v9, 2  ;;  %v114_v20 = vsel %vm113_vm2, %v112_v12, %v111_v16  ;;  %v127_v21 = vrot.slane %v36_v10, 1  ;;  %vm128_vm7 = vcmask 1047559   ;;  %v38_v22 = vld [vmem:[%s3718_s0 + $0x11] sm:$0x1]  ;;  %v2697_v50 = vld [vmem:[%s3720_s2 + $0x48] sm:$0xff] }
   0x7   :  { %v117_v23 = vsel %vm116_vm3, %v115_v13, %v114_v20  ;;  %vm559_vm8 = vcmask 130048   ;;  %v39_v24 = vld [vmem:[%s3718_s0 + $0x21] sm:$0x1]  ;;  %v40_v25 = vld [vmem:[%s3718_s0 + $0x31] sm:$0x1]  ;;  %v139_v26 = vrot.slane %v38_v22, 7 }
   0x8   :  { %v120_v27 = vsel %vm119_vm4, %v118_v14, %v117_v23  ;;  %v41_v28 = vld [vmem:[%s3718_s0 + $0x41] sm:$0x1]  ;;  %v42_v29 = vld [vmem:[%s3718_s0 + $0x51] sm:$0x1]  ;;  %v141_v34 = vrot.slane %v39_v24, 6  ;;  %v143_v35 = vrot.slane %v40_v25, 5 }
   0x9   :  { %v43_v30 = vld [vmem:[%s3718_s0 + $0x61] sm:$0x1]  ;;  %v123_v31 = vsel %vm122_vm5, %v121_v17, %v120_v27  ;;  %v44_v32 = vld [vmem:[%s3718_s0 + $0x71] sm:$0x1]  ;;  %v140_v33 = vsel %vm110_vm1, %v139_v26, %v37_v19  ;;  %v45_v36 = vld [vmem:[%s3718_s0 + $0x2] sm:$0x1] }
   0xa   :  { %v2673_v37 = vld [vmem:[%s3720_s2 + $0x50] sm:$0xff]  ;;  %v126_v38 = vsel %vm125_vm6, %v124_v18, %v123_v31  ;;  %v145_v39 = vrot.slane %v41_v28, 4  ;;  %v147_v40 = vrot.slane %v42_v29, 3  ;;  %v149_v41 = vrot.slane %v43_v30, 2  ;;  %v47_v47 = vld [vmem:[%s3718_s0 + $0x22] sm:$0x1] }
   0xb   :  { %v46_v42 = vld [vmem:[%s3718_s0 + $0x12] sm:$0x1]  ;;  %v2685_v44 = vsel %vm128_vm7, %v127_v21, %v126_v38  ;;  %v142_v45 = vsel %vm113_vm2, %v141_v34, %v140_v33  ;;  %v151_v46 = vrot.slane %v44_v32, 1  ;;  %v49_v52 = vld [vmem:[%s3718_s0 + $0x42] sm:$0x1]  ;;  %v164_v58 = vrot.slane %v47_v47, 6 }
   0xc   :  { %v2682_v43 = vld [vmem:[%s3720_s2 + $0x30] sm:$0xff]  ;;  %v162_v49 = vrot.slane %v46_v42, 7  ;;  %2281 = vmatmul.mubr.msk.f32.vlgmr.msra.gmra.mxu0 %vm559_vm8, %v2685_v44  ;;  %v144_v51 = vsel %vm116_vm3, %v143_v35, %v142_v45  ;;  %v51_v54 = vld [vmem:[%s3718_s0 + $0x62] sm:$0x1]  ;;  %v53_v60 = vld [vmem:[%s3718_s0 + $0x3] sm:$0x1] }
   0xd   :  { %v48_v48 = vld [vmem:[%s3718_s0 + $0x32] sm:$0x1]  ;;  %2308 = vmatpush3.msra.mxu1 %v2682_v43  ;;  %2343 = vmatpush3.msra.mxu0 %v2634_v15  ;;  %v146_v55 = vsel %vm119_vm4, %v145_v39, %v144_v51  ;;  %v168_v62 = vrot.slane %v49_v52, 4  ;;  %v172_v2 = vrot.slane %v51_v54, 2  ;;  %v54_v4 = vld [vmem:[%s3718_s0 + $0x13] sm:$0x1] }
   0xe   :  { %v50_v53 = vld [vmem:[%s3718_s0 + $0x52] sm:$0x1]  ;;  %2309 = vmatprep.subr.mxu1 %v2562_v3  ;;  %2283 = vmatprep.mubr.msk.f32.mxu0 %vm2563_vm0, %v2562_v3  ;;  %v163_v57 = vsel %vm110_vm1, %v162_v49, %v45_v36  ;;  %v166_v59 = vrot.slane %v48_v48, 5  ;;  %v148_v61 = vsel %vm122_vm5, %v147_v40, %v146_v55  ;;  %v2732_v5 = vld [vmem:[%s3720_s2 + $0x40] sm:$0xff]  ;;  %v2737_v6 = vld [vmem:[%s3720_s2 + $0x28] sm:$0xff]  ;;  %v185_v12 = vrot.slane %v54_v4, 7 }
   0xf   :  { %v52_v56 = vld [vmem:[%s3718_s0 + $0x72] sm:$0x1]  ;;  %v170_v63 = vrot.slane %v50_v53, 3  ;;  %2344 = vmatprep.subr.mxu0 %v2673_v37  ;;  %v150_v7 = vsel %vm125_vm6, %v149_v41, %v148_v61  ;;  %v165_v8 = vsel %vm113_vm2, %v164_v58, %v163_v57  ;;  %v55_v10 = vld [vmem:[%s3718_s0 + $0x23] sm:$0x1]  ;;  %2310 = vmatpush3.msra.mxu1 %v2737_v6 }
  0x10   :  { %v174_v9 = vrot.slane %v52_v56, 1  ;;  %2345 = vmatpush3.msra.mxu0 %v2673_v37  ;;  %v56_v11 = vld [vmem:[%s3718_s0 + $0x33] sm:$0x1]  ;;  %v2750_v13 = vsel %vm128_vm7, %v151_v46, %v150_v7  ;;  %v167_v14 = vsel %vm116_vm3, %v166_v59, %v165_v8  ;;  %v57_v16 = vld [vmem:[%s3718_s0 + $0x43] sm:$0x1]  ;;  %2311 = vmatprep.subr.mxu1 %v2562_v3  ;;  %v186_v21 = vsel %vm110_vm1, %v185_v12, %v53_v60 }
  0x11   :  { %v58_v17 = vld [vmem:[%s3718_s0 + $0x53] sm:$0x1]  ;;  %v59_v18 = vld [vmem:[%s3718_s0 + $0x63] sm:$0x1]  ;;  %2346 = vmatprep.subr.mxu0 %v2697_v50  ;;  %2284 = vmatmul.mubr.msk.f32.gmra.mxu0 %vm559_vm8, %v2750_v13  ;;  %v169_v19 = vsel %vm119_vm4, %v168_v62, %v167_v14  ;;  %v187_v22 = vrot.slane %v55_v10, 6  ;;  %v189_v23 = vrot.slane %v56_v11, 5 }
  0x12   :  { %v60_v20 = vld [vmem:[%s3718_s0 + $0x73] sm:$0x1]  ;;  %v61_v24 = vld [vmem:[%s3718_s0 + $0x4] sm:$0x1]  ;;  %2286 = vmatprep.mubr.msk.f32.mxu0 %vm2563_vm0, %v2562_v3  ;;  %v171_v25 = vsel %vm122_vm5, %v170_v63, %v169_v19  ;;  %v191_v26 = vrot.slane %v57_v16, 4  ;;  %v193_v27 = vrot.slane %v58_v17, 3  ;;  %2347 = vmatpush3.msra.mxu0 %v2697_v50 }
  0x13   :  { %v195_v28 = vrot.slane %v59_v18, 2  ;;  %v62_v29 = vld [vmem:[%s3718_s0 + $0x14] sm:$0x1]  ;;  %v173_v30 = vsel %vm125_vm6, %v172_v2, %v171_v25  ;;  %v188_v31 = vsel %vm113_vm2, %v187_v22, %v186_v21  ;;  %v197_v32 = vrot.slane %v60_v20, 1  ;;  %v63_v33 = vld [vmem:[%s3718_s0 + $0x24] sm:$0x1]  ;;  %2348 = vmatprep.subr.mxu0 %v2732_v5 }
  0x14   :  { %v64_v34 = vld [vmem:[%s3718_s0 + $0x34] sm:$0x1]  ;;  %v208_v35 = vrot.slane %v62_v29, 7  ;;  %v2791_v36 = vsel %vm128_vm7, %v174_v9, %v173_v30  ;;  %v190_v38 = vsel %vm116_vm3, %v189_v23, %v188_v31  ;;  %v65_v39 = vld [vmem:[%s3718_s0 + $0x44] sm:$0x1]  ;;  %2349 = vmatpush3.msra.mxu0 %v2732_v5  ;;  %v210_v47 = vrot.slane %v63_v33, 6 }
  0x15   :  { %v66_v40 = vld [vmem:[%s3718_s0 + $0x54] sm:$0x1]  ;;  %v67_v41 = vld [vmem:[%s3718_s0 + $0x64] sm:$0x1]  ;;  %2287 = vmatmul.mubr.msk.f32.gmra.mxu0 %vm559_vm8, %v2791_v36  ;;  %v192_v42 = vsel %vm119_vm4, %v191_v26, %v190_v38  ;;  %v212_v48 = vrot.slane %v64_v34, 5  ;;  %2364 = vmatprep.subr.mxu0 %v2562_v3  ;;  %v214_v52 = vrot.slane %v65_v39, 4 }
  0x16   :  { %v68_v45 = vld [vmem:[%s3718_s0 + $0x74] sm:$0x1]  ;;  %v209_v46 = vsel %vm110_vm1, %v208_v35, %v61_v24  ;;  %v69_v49 = vld [vmem:[%s3718_s0 + $0x5] sm:$0x1]  ;;  %2289 = vmatprep.mubr.msk.f32.mxu0 %vm2563_vm0, %v2562_v3  ;;  %v194_v51 = vsel %vm122_vm5, %v193_v27, %v192_v42  ;;  %v216_v53 = vrot.slane %v66_v40, 3  ;;  %v218_v54 = vrot.slane %v67_v41, 2 }
  0x17   :  { %v70_v55 = vld [vmem:[%s3718_s0 + $0x15] sm:$0x1]  ;;  %v196_v56 = vsel %vm125_vm6, %v195_v28, %v194_v51  ;;  %v211_v57 = vsel %vm113_vm2, %v210_v47, %v209_v46  ;;  %v220_v58 = vrot.slane %v68_v45, 1  ;;  %v71_v59 = vld [vmem:[%s3718_s0 + $0x25] sm:$0x1] }
  0x18   :  { %v72_v60 = vld [vmem:[%s3718_s0 + $0x35] sm:$0x1]  ;;  %v231_v61 = vrot.slane %v70_v55, 7  ;;  %v2830_v62 = vsel %vm128_vm7, %v197_v32, %v196_v56  ;;  %v213_v63 = vsel %vm116_vm3, %v212_v48, %v211_v57  ;;  %v73_v2 = vld [vmem:[%s3718_s0 + $0x45] sm:$0x1]  ;;  %v233_v11 = vrot.slane %v71_v59, 6 }
  0x19   :  { %v74_v4 = vld [vmem:[%s3718_s0 + $0x55] sm:$0x1]  ;;  %v75_v7 = vld [vmem:[%s3718_s0 + $0x65] sm:$0x1]  ;;  %2290 = vmatmul.mubr.msk.f32.gmra.mxu0 %vm559_vm8, %v2830_v62  ;;  %v215_v8 = vsel %vm119_vm4, %v214_v52, %v213_v63  ;;  %v235_v12 = vrot.slane %v72_v60, 5  ;;  %v237_v17 = vrot.slane %v73_v2, 4 }
  0x1a   :  { %v76_v9 = vld [vmem:[%s3718_s0 + $0x75] sm:$0x1]  ;;  %v232_v10 = vsel %vm110_vm1, %v231_v61, %v69_v49  ;;  %v77_v14 = vld [vmem:[%s3718_s0 + $0x6] sm:$0x1]  ;;  %2292 = vmatprep.mubr.msk.f32.mxu0 %vm2563_vm0, %v2562_v3  ;;  %v217_v16 = vsel %vm122_vm5, %v216_v53, %v215_v8  ;;  %v239_v18 = vrot.slane %v74_v4, 3  ;;  %v241_v19 = vrot.slane %v75_v7, 2 }
  0x1b   :  { %v78_v20 = vld [vmem:[%s3718_s0 + $0x16] sm:$0x1]  ;;  %v219_v21 = vsel %vm125_vm6, %v218_v54, %v217_v16  ;;  %v234_v22 = vsel %vm113_vm2, %v233_v11, %v232_v10  ;;  %v243_v23 = vrot.slane %v76_v9, 1  ;;  %v79_v24 = vld [vmem:[%s3718_s0 + $0x26] sm:$0x1] }
  0x1c   :  { %v80_v25 = vld [vmem:[%s3718_s0 + $0x36] sm:$0x1]  ;;  %v254_v26 = vrot.slane %v78_v20, 7  ;;  %v2867_v27 = vsel %vm128_vm7, %v220_v58, %v219_v21  ;;  %v236_v28 = vsel %vm116_vm3, %v235_v12, %v234_v22  ;;  %v81_v29 = vld [vmem:[%s3718_s0 + $0x46] sm:$0x1]  ;;  %v256_v35 = vrot.slane %v79_v24, 6 }
  0x1d   :  { %v82_v30 = vld [vmem:[%s3718_s0 + $0x56] sm:$0x1]  ;;  %v83_v31 = vld [vmem:[%s3718_s0 + $0x66] sm:$0x1]  ;;  %2293 = vmatmul.mubr.msk.f32.gmra.mxu0 %vm559_vm8, %v2867_v27  ;;  %v238_v32 = vsel %vm119_vm4, %v237_v17, %v236_v28  ;;  %v258_v38 = vrot.slane %v80_v25, 5  ;;  %v260_v41 = vrot.slane %v81_v29, 4 }
  0x1e   :  { %v84_v33 = vld [vmem:[%s3718_s0 + $0x76] sm:$0x1]  ;;  %v255_v34 = vsel %vm110_vm1, %v254_v26, %v77_v14  ;;  %v85_v39 = vld [vmem:[%s3718_s0 + $0x7] sm:$0x1]  ;;  %2295 = vmatprep.mubr.msk.f32.mxu0 %vm2563_vm0, %v2562_v3  ;;  %v240_v40 = vsel %vm122_vm5, %v239_v18, %v238_v32  ;;  %v262_v42 = vrot.slane %v82_v30, 3  ;;  %v264_v45 = vrot.slane %v83_v31, 2 }
  0x1f   :  { %v86_v46 = vld [vmem:[%s3718_s0 + $0x17] sm:$0x1]  ;;  %v242_v47 = vsel %vm125_vm6, %v241_v19, %v240_v40  ;;  %v257_v48 = vsel %vm113_vm2, %v256_v35, %v255_v34  ;;  %v266_v49 = vrot.slane %v84_v33, 1  ;;  %v87_v51 = vld [vmem:[%s3718_s0 + $0x27] sm:$0x1] }
  0x20   :  { %v88_v52 = vld [vmem:[%s3718_s0 + $0x37] sm:$0x1]  ;;  %v277_v53 = vrot.slane %v86_v46, 7  ;;  %v2904_v54 = vsel %vm128_vm7, %v243_v23, %v242_v47  ;;  %v259_v55 = vsel %vm116_vm3, %v258_v38, %v257_v48  ;;  %v89_v56 = vld [vmem:[%s3718_s0 + $0x47] sm:$0x1]  ;;  %v279_v63 = vrot.slane %v87_v51, 6 }
  0x21   :  { %v90_v57 = vld [vmem:[%s3718_s0 + $0x57] sm:$0x1]  ;;  %v91_v58 = vld [vmem:[%s3718_s0 + $0x67] sm:$0x1]  ;;  %2296 = vmatmul.mubr.msk.f32.gmra.mxu0 %vm559_vm8, %v2904_v54  ;;  %v261_v59 = vsel %vm119_vm4, %v260_v41, %v259_v55  ;;  %v281_v2 = vrot.slane %v88_v52, 5  ;;  %v283_v8 = vrot.slane %v89_v56, 4 }
  0x22   :  { %v92_v60 = vld [vmem:[%s3718_s0 + $0x77] sm:$0x1]  ;;  %v278_v61 = vsel %vm110_vm1, %v277_v53, %v85_v39  ;;  %v93_v4 = vld [vmem:[%s3718_s0 + $0x8] sm:$0x1]  ;;  %2298 = vmatprep.mubr.msk.f32.mxu0 %vm2563_vm0, %v2562_v3  ;;  %v263_v7 = vsel %vm122_vm5, %v262_v42, %v261_v59  ;;  %v285_v9 = vrot.slane %v90_v57, 3  ;;  %v287_v10 = vrot.slane %v91_v58, 2 }
  0x23   :  { %v94_v11 = vld [vmem:[%s3718_s0 + $0x18] sm:$0x1]  ;;  %v265_v12 = vsel %vm125_vm6, %v264_v45, %v263_v7  ;;  %v280_v14 = vsel %vm113_vm2, %v279_v63, %v278_v61  ;;  %v289_v16 = vrot.slane %v92_v60, 1  ;;  %v95_v17 = vld [vmem:[%s3718_s0 + $0x28] sm:$0x1] }
  0x24   :  { %v96_v18 = vld [vmem:[%s3718_s0 + $0x38] sm:$0x1]  ;;  %v300_v19 = vrot.slane %v94_v11, 7  ;;  %v2941_v20 = vsel %vm128_vm7, %v266_v49, %v265_v12  ;;  %v282_v21 = vsel %vm116_vm3, %v281_v2, %v280_v14  ;;  %v97_v22 = vld [vmem:[%s3718_s0 + $0x48] sm:$0x1]  ;;  %v302_v29 = vrot.slane %v95_v17, 6 }
  0x25   :  { %v98_v23 = vld [vmem:[%s3718_s0 + $0x58] sm:$0x1]  ;;  %v99_v24 = vld [vmem:[%s3718_s0 + $0x68] sm:$0x1]  ;;  %2299 = vmatmul.mubr.msk.f32.gmra.mxu0 %vm559_vm8, %v2941_v20  ;;  %v284_v25 = vsel %vm119_vm4, %v283_v8, %v282_v21  ;;  %v304_v30 = vrot.slane %v96_v18, 5  ;;  %v306_v32 = vrot.slane %v97_v22, 4 }
  0x26   :  { %v100_v26 = vld [vmem:[%s3718_s0 + $0x78] sm:$0x1]  ;;  %v301_v28 = vsel %vm110_vm1, %v300_v19, %v93_v4  ;;  %2301 = vmatprep.mubr.msk.f32.mxu0 %vm2563_vm0, %v2562_v3  ;;  %v286_v31 = vsel %vm122_vm5, %v285_v9, %v284_v25  ;;  %v308_v33 = vrot.slane %v98_v23, 3 }
  0x27   :  { %8 = vsyncpa [#allocation3], 0  ;;  %v288_v34 = vsel %vm125_vm6, %v287_v10, %v286_v31  ;;  %v303_v35 = vsel %vm113_vm2, %v302_v29, %v301_v28  ;;  %v310_v38 = vrot.slane %v99_v24, 2  ;;  %v312_v41 = vrot.slane %v100_v26, 1  ;;  %v19_v48 = vld [vmem:[%s3720_s2 + $0x20] sm:$0xff]  ;;  %s2564_s17 = smov 32  }
  0x28   :  { %v2966_v39 = vsel %vm128_vm7, %v289_v16, %v288_v34  ;;  %v305_v40 = vsel %vm116_vm3, %v304_v30, %v303_v35  ;;  %vm692_vm9 = vcmask 261120   ;;  %2312 = vmatpush3.msra.mxu1 %v19_v48  ;;  %v555_v49 = vlaneseq  ;;  %v3020_v53 = vld [vmem:[%s3720_s2 + $0x10] sm:$0x1] }
  0x29   :  { %2302 = vmatmul.mubr.msk.f32.gmra.mxu0 %vm559_vm8, %v2966_v39  ;;  %v307_v42 = vsel %vm119_vm4, %v306_v32, %v305_v40  ;;  %2313 = vmatprep.subr.mxu1 %v2562_v3  ;;  %vm1379_vm10 = vcmask 1043456   ;;  %vm1362_vm11 = vcmask 31744   ;;  %vm1234_vm12 = vcmask 392192   ;;  %vm3447_vm13 = vmneg %vm692_vm9 }
  0x2a   :  { %2304 = vmatprep.mubr.msk.f32.mxu0 %vm2563_vm0, %v2562_v3  ;;  %v309_v45 = vsel %vm122_vm5, %v308_v33, %v307_v42  ;;  %v556_v51 = vshrl.u32 %v555_v49, 7  ;;  %vm2052_vm14 = vcmask 523264   ;;  %vm2064_vm15 = vcmask 0  }
  0x2b   :  { %v311_v46 = vsel %vm125_vm6, %v310_v38, %v309_v45 }
  0x2c   :  { %v2977_v47 = vsel %vm128_vm7, %v312_v41, %v311_v46  ;;  %v3015_v52 = vsub.s32 0, %v556_v51 }
  0x2d   :  { %2305 = vmatmul.mubr.msk.f32.gmra.mxu0 %vm559_vm8, %v2977_v47 }
  0x2e   :  { %2350 = vmatprep.mubr.msk.f32.mxu0 %vm692_vm9, %v2596_v1  ;;  %v3004_v1 = vld [vmem:[%s3720_s2 + $0x60] sm:$0xf]  ;;  %v558_v55 = vrot.slane %v3020_v53, %v3015_v52 }
  0x31   :  { %2351 = vmatmul.mubr.msk.f32.vlgmr.msra.gmra.mxu0 %vm692_vm9, %v2591_v0  ;;  %v18_v0 = vld [vmem:[%s3720_s2 + $0x18] sm:$0xff] }
  0x32   :  { %2365 = vmatpush3.msra.mxu0 %v2682_v43  ;;  %2372 = vmatprep.mubr.msk.f32.mxu0 %vm2563_vm0, %v2562_v3 }
  0x33   :  { %2366 = vmatprep.subr.mxu0 %v2562_v3  ;;  %2314 = vmatpush3.msra.mxu1 %v18_v0 }
  0x34   :  { %2367 = vmatpush3.msra.mxu0 %v2737_v6  ;;  %2353 = vmatprep.subr.mxu1 %v2682_v43 }
  0x35   :  { %2368 = vmatprep.subr.mxu0 %v2562_v3 }
  0x36   :  { %2369 = vmatpush3.msra.mxu0 %v19_v48 }
  0x37   :  { %2370 = vmatprep.subr.mxu0 %v2562_v3 }
  0x38   :  { %2371 = vmatpush3.msra.mxu0 %v18_v0 }
  0x39   :  { %2386 = vmatprep.subr.mxu0 %v2562_v3  ;;  %2373 = vmatmul.mubr.msk.f32.vlgmr.msra.gmra.mxu0 %vm692_vm9, %v3004_v1 }
  0x3a   :  { %2387 = vmatpush3.msra.mxu0 %v2682_v43  ;;  %2394 = vmatprep.mubr.msk.f32.mxu0 %vm2563_vm0, %v2562_v3 }
  0x3b   :  { %2388 = vmatprep.subr.mxu0 %v2562_v3 }
  0x3c   :  { %2389 = vmatpush3.msra.mxu0 %v2737_v6 }
  0x3d   :  { %2390 = vmatprep.subr.mxu0 %v2562_v3 }
  0x3e   :  { %2391 = vmatpush3.msra.mxu0 %v19_v48 }
  0x3f   :  { %2392 = vmatprep.subr.mxu0 %v2562_v3 }
  0x40   :  { %2393 = vmatpush3.msra.mxu0 %v18_v0 }
  0xcc   :  { %v644_v56 = vpop.f32.mrf.mxu0 }
  0xcd   :  { %v3024_v57 = vadd.f32 %v644_v56, %v558_v55 }
  0xce   :  { %v2282_v58 = vpop.f32.mrf.mxu0 }
  0xcf   :  { %2316 = vmatmul.mubr.msk.f32.vlgmr.msra.gmra.mxu1 %vm692_vm9, %v3024_v57 }
  0xd0   :  { %2354 = vmatpush3.msra.mxu1 %v2682_v43  ;;  %2318 = vmatprep.mubr.msk.f32.mxu1 %vm2563_vm0, %v2562_v3 }
  0xd1   :  { %v649_v59 = vpop.f32.mrf.mxu0  ;;  %2355 = vmatprep.subr.mxu1 %v2737_v6 }
  0xd2   :  { %v3032_v60 = vadd.f32 %v649_v59, %v558_v55  ;;  %2356 = vmatpush3.msra.mxu1 %v2737_v6 }
  0xd3   :  { %v2285_v61 = vpop.f32.mrf.mxu0  ;;  %2357 = vmatprep.subr.mxu1 %v19_v48 }
  0xd4   :  { %2319 = vmatmul.mubr.msk.f32.gmra.mxu1 %vm692_vm9, %v3032_v60 }
  0xd5   :  { %v654_v63 = vpop.f32.mrf.mxu0  ;;  %2321 = vmatprep.mubr.msk.f32.mxu1 %vm2563_vm0, %v2562_v3  ;;  %2358 = vmatpush3.msra.mxu1 %v19_v48 }
  0xd6   :  { %v3039_v43 = vadd.f32 %v654_v63, %v558_v55  ;;  %2359 = vmatprep.subr.mxu1 %v18_v0  ;;  %v316_v63 = vld [vmem:[%s3719_s1 + $0x8] sm:$0x1] }
  0xd7   :  { %v2288_v2 = vpop.f32.mrf.mxu0  ;;  %2360 = vmatpush3.msra.mxu1 %v18_v0 }
  0xd8   :  { %2322 = vmatmul.mubr.msk.f32.gmra.mxu1 %vm692_vm9, %v3039_v43  ;;  %2375 = vmatprep.subr.mxu1 %v2562_v3 }
  0xd9   :  { %v659_v6 = vpop.f32.mrf.mxu0  ;;  %2324 = vmatprep.mubr.msk.f32.mxu1 %vm2563_vm0, %v2562_v3 }
  0xda   :  { %v3046_v4 = vadd.f32 %v659_v6, %v558_v55 }
  0xdb   :  { %v2291_v7 = vpop.f32.mrf.mxu0 }
  0xdc   :  { %2325 = vmatmul.mubr.msk.f32.gmra.mxu1 %vm692_vm9, %v3046_v4  ;;  %v317_v7 = vld [vmem:[%s3719_s1 + $0x10] sm:$0x1] }
  0xdd   :  { %v664_v8 = vpop.f32.mrf.mxu0  ;;  %2327 = vmatprep.mubr.msk.f32.mxu1 %vm2563_vm0, %v2562_v3 }
  0xde   :  { %v3052_v9 = vadd.f32 %v664_v8, %v558_v55  ;;  %v387_v8 = vrot.slane %v316_v63, 7 }
  0xdf   :  { %v2294_v10 = vpop.f32.mrf.mxu0 }
  0xe0   :  { %2328 = vmatmul.mubr.msk.f32.gmra.mxu1 %vm692_vm9, %v3052_v9  ;;  %v324_v10 = vld [vmem:[%s3719_s1 + $0x9] sm:$0x1] }
  0xe1   :  { %v669_v11 = vpop.f32.mrf.mxu0  ;;  %2330 = vmatprep.mubr.msk.f32.mxu1 %vm2563_vm0, %v2562_v3 }
  0xe2   :  { %v3058_v12 = vadd.f32 %v669_v11, %v558_v55 }
  0xe3   :  { %v2297_v14 = vpop.f32.mrf.mxu0 }
  0xe4   :  { %2331 = vmatmul.mubr.msk.f32.gmra.mxu1 %vm692_vm9, %v3058_v12  ;;  %v315_v14 = vld [vmem:[%s3719_s1] sm:$0x1] }
  0xe5   :  { %v674_v16 = vpop.f32.mrf.mxu0  ;;  %2333 = vmatprep.mubr.msk.f32.mxu1 %vm2563_vm0, %v2562_v3 }
  0xe6   :  { %v3064_v17 = vadd.f32 %v674_v16, %v558_v55  ;;  %v318_v16 = vld [vmem:[%s3719_s1 + $0x18] sm:$0x1] }
  0xe7   :  { %v2300_v18 = vpop.f32.mrf.mxu0 }
  0xe8   :  { %2334 = vmatmul.mubr.msk.f32.gmra.mxu1 %vm692_vm9, %v3064_v17  ;;  %v389_v18 = vrot.slane %v317_v7, 6  ;;  %v327_v7 = vld [vmem:[%s3719_s1 + $0x21] sm:$0x1] }
  0xe9   :  { %v679_v19 = vpop.f32.mrf.mxu0  ;;  %2336 = vmatprep.mubr.msk.f32.mxu1 %vm2563_vm0, %v2562_v3 }
  0xea   :  { %v3070_v21 = vadd.f32 %v679_v19, %v558_v55 }
  0xeb   :  { %v2303_v22 = vpop.f32.mrf.mxu0 }
  0xec   :  { %2337 = vmatmul.mubr.msk.f32.gmra.mxu1 %vm692_vm9, %v3070_v21 }
  0xed   :  { %v684_v23 = vpop.f32.mrf.mxu0  ;;  %2339 = vmatprep.mubr.msk.f32.mxu1 %vm2563_vm0, %v2562_v3 }
  0xee   :  { %v685_v24 = vadd.f32 %v684_v23, %v558_v55  ;;  %v319_v23 = vld [vmem:[%s3719_s1 + $0x20] sm:$0x1] }
  0xef   :  { %v2306_v25 = vpop.f32.mrf.mxu0 }
  0xf0   :  { %2340 = vmatmul.mubr.msk.f32.gmra.mxu1 %vm692_vm9, %v685_v24  ;;  %v388_v24 = vsel %vm110_vm1, %v387_v8, %v315_v14  ;;  %v391_v25 = vrot.slane %v318_v16, 5  ;;  %v334_v8 = vld [vmem:[%s3719_s1 + $0x1a] sm:$0x1]  ;;  %v331_v16 = vld [vmem:[%s3719_s1 + $0x2] sm:$0x1] }
  0xf1   :  { %v2352_v26 = vpop.f32.mrf.mxu0 }
  0xf3   :  { %v911_v28 = vpop.f32.mrf.mxu0 }
  0xf4   :  { %2361 = vmatprep.mubr.msk.f32.mxu1 %vm692_vm9, %v911_v28  ;;  %v320_v28 = vld [vmem:[%s3719_s1 + $0x28] sm:$0x1] }
  0xf5   :  { %2362 = vmatmul.mubr.msk.f32.vlgmr.msra.gmra.mxu1 %vm692_vm9, %v2352_v26 }
  0xf6   :  { %2376 = vmatpush3.msra.mxu1 %v2634_v15  ;;  %2383 = vmatprep.mubr.msk.f32.mxu1 %vm2563_vm0, %v2562_v3 }
  0xf7   :  { %2377 = vmatprep.subr.mxu1 %v2562_v3 }
  0xf8   :  { %2378 = vmatpush3.msra.mxu1 %v2673_v37  ;;  %v3094_v37 = vld [vmem:[%s3720_s2 + $0x38] sm:$0x1] }
  0xf9   :  { %2379 = vmatprep.subr.mxu1 %v2562_v3  ;;  %v1070_v29 = vpop.f32.mrf.mxu0 }
  0xfa   :  { %2380 = vmatpush3.msra.mxu1 %v2697_v50  ;;  %1349 = vrot.lane.b32.xlu1 %v1070_v29, %s2564_s17  ;;  %v3098_v50 = vrot.slane %v3094_v37, %v3015_v52  ;;  %v390_v29 = vsel %vm113_vm2, %v389_v18, %v388_v24  ;;  %v335_v18 = vld [vmem:[%s3719_s1 + $0x22] sm:$0x1] }
  0xfb   :  { %2381 = vmatprep.subr.mxu1 %v2562_v3  ;;  %v2374_v15 = vpop.f32.mrf.mxu0 }
  0xfc   :  { %2382 = vmatpush3.msra.mxu1 %v2732_v5  ;;  %v393_v15 = vrot.slane %v319_v23, 4 }
  0xfd   :  { %2384 = vmatmul.mubr.msk.f32.vlgmr.msra.gmra.mxu1 %vm692_vm9, %v3020_v53 }
 0x18f   :  { %v786_v30 = vpop.f32.mrf.mxu1 }
 0x190   :  { %v787_v31 = vadd.f32 %v786_v30, %v3098_v50 }
 0x191   :  { %v2317_v32 = vpop.f32.mrf.mxu1 }
 0x192   :  { %v830_v34 = vsub.f32 %v787_v31, %v2685_v44  ;;  %v392_v32 = vsel %vm116_vm3, %v391_v25, %v390_v29 }
 0x194   :  { %v791_v33 = vpop.f32.mrf.mxu1  ;;  %v2022_v42 = vmul.f32 %v830_v34, %v830_v34  ;;  %v409_v34 = vrot.slane %v324_v10, 7 }
 0x195   :  { %v792_v35 = vadd.f32 %v791_v33, %v3098_v50  ;;  %v325_v33 = vld [vmem:[%s3719_s1 + $0x11] sm:$0x1] }
 0x196   :  { %v2320_v38 = vpop.f32.mrf.mxu1 }
 0x197   :  { %v831_v40 = vsub.f32 %v792_v35, %v2750_v13  ;;  %v1350_v38 = vpop.permute.xlu1 %1349 }
 0x198   :  { %v796_v41 = vpop.f32.mrf.mxu1 }
 0x199   :  { %v2023_v45 = vmul.f32 %v831_v40, %v831_v40  ;;  %v797_v46 = vadd.f32 %v796_v41, %v3098_v50  ;;  %v321_v40 = vld [vmem:[%s3719_s1 + $0x30] sm:$0x1]  ;;  %v395_v41 = vrot.slane %v320_v28, 3 }
 0x19a   :  { %v2323_v48 = vpop.f32.mrf.mxu1 }
 0x19b   :  { %v2032_v0 = vadd.f32 %v2023_v45, %v2022_v42  ;;  %v832_v49 = vsub.f32 %v797_v46, %v2791_v36  ;;  %v323_v42 = vld [vmem:[%s3719_s1 + $0x1] sm:$0x1]  ;;  %v3147_v48 = vsel %vm692_vm9, %v3004_v1, %v1350_v38  ;;  %v332_v1 = vld [vmem:[%s3719_s1 + $0xa] sm:$0x1] }
 0x19c   :  { %v801_v51 = vpop.f32.mrf.mxu1  ;;  %2418 = vmatprep.subr.msk.mxu0 %vm1379_vm10, %v3147_v48  ;;  %v431_v24 = vrot.slane %v332_v1, 7 }
 0x19d   :  { %v2024_v53 = vmul.f32 %v832_v49, %v832_v49  ;;  %v802_v55 = vadd.f32 %v801_v51, %v3098_v50  ;;  %v326_v51 = vld [vmem:[%s3719_s1 + $0x19] sm:$0x1] }
 0x19e   :  { %v2326_v56 = vpop.f32.mrf.mxu1  ;;  %v413_v14 = vrot.slane %v326_v51, 5  ;;  %v432_v38 = vsel %vm110_vm1, %v431_v24, %v331_v16  ;;  %v339_v51 = vld [vmem:[%s3719_s1 + $0x3] sm:$0x1]  ;;  %v3245_v24 = vld [vmem:[%s3719_s1 + $0x3a] sm:$0x1] }
 0x19f   :  { %v2033_v58 = vadd.f32 %v2032_v0, %v2024_v53  ;;  %v833_v59 = vsub.f32 %v802_v55, %v2830_v62  ;;  %v394_v0 = vsel %vm119_vm4, %v393_v15, %v392_v32  ;;  %v411_v53 = vrot.slane %v325_v33, 6  ;;  %v341_v32 = vld [vmem:[%s3719_s1 + $0x13] sm:$0x1] }
 0x1a0   :  { %v806_v61 = vpop.f32.mrf.mxu1  ;;  %v455_v1 = vrot.slane %v341_v32, 6 }
 0x1a1   :  { %v2025_v2 = vmul.f32 %v833_v59, %v833_v59  ;;  %v807_v6 = vadd.f32 %v806_v61, %v3098_v50  ;;  %v410_v59 = vsel %vm110_vm1, %v409_v34, %v323_v42  ;;  %v333_v61 = vld [vmem:[%s3719_s1 + $0x12] sm:$0x1] }
 0x1a2   :  { %v2329_v11 = vpop.f32.mrf.mxu1  ;;  %v412_v23 = vsel %vm113_vm2, %v411_v53, %v410_v59  ;;  %v433_v25 = vrot.slane %v333_v61, 6 }
 0x1a3   :  { %v2034_v19 = vadd.f32 %v2033_v58, %v2025_v2  ;;  %v834_v22 = vsub.f32 %v807_v6, %v2867_v27  ;;  %v397_v58 = vrot.slane %v321_v40, 2  ;;  %v3166_v2 = vld [vmem:[%s3719_s1 + $0x38] sm:$0x1]  ;;  %v396_v6 = vsel %vm122_vm5, %v395_v41, %v394_v0  ;;  %v342_v41 = vld [vmem:[%s3719_s1 + $0x1b] sm:$0x1] }
 0x1a4   :  { %v811_v26 = vpop.f32.mrf.mxu1  ;;  %v399_v34 = vrot.slane %v3166_v2, 1  ;;  %v437_v40 = vrot.slane %v335_v18, 4  ;;  %v336_v0 = vld [vmem:[%s3719_s1 + $0x2a] sm:$0x1]  ;;  %v3224_v2 = vld [vmem:[%s3719_s1 + $0x39] sm:$0x1] }
 0x1a5   :  { %v2026_v30 = vmul.f32 %v834_v22, %v834_v22  ;;  %v812_v31 = vadd.f32 %v811_v26, %v3098_v50  ;;  %v3185_v22 = vld [vmem:[%s3719_s1 + $0x29] sm:$0x1]  ;;  %v435_v26 = vrot.slane %v334_v8, 5  ;;  %v398_v15 = vsel %vm125_vm6, %v397_v58, %v396_v6  ;;  %v343_v58 = vld [vmem:[%s3719_s1 + $0x23] sm:$0x1] }
 0x1a6   :  { %v2332_v35 = vpop.f32.mrf.mxu1  ;;  %v457_v8 = vrot.slane %v342_v41, 5  ;;  %v439_v16 = vrot.slane %v336_v0, 3  ;;  %v348_v18 = vld [vmem:[%s3719_s1 + $0xc] sm:$0x1]  ;;  %v3270_v41 = vld [vmem:[%s3719_s1 + $0x3b] sm:$0x1] }
 0x1a7   :  { %v2035_v45 = vadd.f32 %v2034_v19, %v2026_v30  ;;  %v835_v46 = vsub.f32 %v812_v31, %v2904_v54  ;;  %v3193_v30 = vld [vmem:[%s3719_s1 + $0x31] sm:$0x1]  ;;  %v340_v31 = vld [vmem:[%s3719_s1 + $0xb] sm:$0x1]  ;;  %v415_v35 = vrot.slane %v327_v7, 4 }
 0x1a8   :  { %v816_v49 = vpop.f32.mrf.mxu1  ;;  %v453_v59 = vrot.slane %v340_v31, 7  ;;  %v419_v6 = vrot.slane %v3193_v30, 2  ;;  %v337_v7 = vld [vmem:[%s3719_s1 + $0x32] sm:$0x1]  ;;  %v344_v31 = vld [vmem:[%s3719_s1 + $0x2b] sm:$0x1] }
 0x1a9   :  { %v2027_v55 = vmul.f32 %v835_v46, %v835_v46  ;;  %v817_v56 = vadd.f32 %v816_v49, %v3098_v50  ;;  %v414_v46 = vsel %vm116_vm3, %v413_v14, %v412_v23  ;;  %v434_v49 = vsel %vm113_vm2, %v433_v25, %v432_v38 }
 0x1aa   :  { %v2335_v63 = vpop.f32.mrf.mxu1  ;;  %v441_v30 = vrot.slane %v337_v7, 2  ;;  %v3260_v38 = vsel %vm128_vm7, %v399_v34, %v398_v15  ;;  %v356_v15 = vld [vmem:[%s3719_s1 + $0xd] sm:$0x1] }
 0x1ab   :  { %v2036_v10 = vadd.f32 %v2035_v45, %v2027_v55  ;;  %v836_v11 = vsub.f32 %v817_v56, %v2941_v20  ;;  %v417_v55 = vrot.slane %v3185_v22, 3  ;;  %v436_v56 = vsel %vm116_vm3, %v435_v26, %v434_v49 }
 0x1ac   :  { %v821_v19 = vpop.f32.mrf.mxu1  ;;  %v438_v14 = vsel %vm119_vm4, %v437_v40, %v436_v56  ;;  %v459_v26 = vrot.slane %v343_v58, 4  ;;  %v3265_v40 = vld [vmem:[%s3719_s1 + $0x33] sm:$0x1]  ;;  %v443_v49 = vrot.slane %v3245_v24, 1  ;;  %v358_v56 = vld [vmem:[%s3719_s1 + $0x1d] sm:$0x1] }
 0x1ad   :  { %v2028_v28 = vmul.f32 %v836_v11, %v836_v11  ;;  %v822_v29 = vadd.f32 %v821_v19, %v3098_v50  ;;  %v416_v11 = vsel %vm119_vm4, %v415_v35, %v414_v46  ;;  %v349_v19 = vld [vmem:[%s3719_s1 + $0x14] sm:$0x1]  ;;  %v440_v0 = vsel %vm122_vm5, %v439_v16, %v438_v14  ;;  %v3307_v16 = vld [vmem:[%s3720_s2 + $0x68] sm:$0x1] }
 0x1ae   :  { %v2338_v33 = vpop.f32.mrf.mxu1  ;;  %v477_v46 = vrot.slane %v349_v19, 6  ;;  %v418_v34 = vsel %vm122_vm5, %v417_v55, %v416_v11  ;;  %v352_v55 = vld [vmem:[%s3719_s1 + $0x2c] sm:$0x1]  ;;  %v355_v11 = vld [vmem:[%s3719_s1 + $0x5] sm:$0x1] }
 0x1af   :  { %v2037_v42 = vadd.f32 %v2036_v10, %v2028_v28  ;;  %v837_v45 = vsub.f32 %v822_v29, %v2966_v39  ;;  %v350_v28 = vld [vmem:[%s3719_s1 + $0x1c] sm:$0x1]  ;;  %v421_v29 = vrot.slane %v3224_v2, 1  ;;  %v347_v33 = vld [vmem:[%s3719_s1 + $0x4] sm:$0x1]  ;;  %v420_v24 = vsel %vm125_vm6, %v419_v6, %v418_v34 }
 0x1b0   :  { %v826_v53 = vpop.f32.mrf.mxu1  ;;  %v3329_v6 = vld [vmem:[%s3719_s1 + $0x3c] sm:$0x1]  ;;  %v369_v2 = vld [vmem:[%s3719_s1 + $0x36] sm:$0x1] }
 0x1b1   :  { %v2029_v61 = vmul.f32 %v837_v45, %v837_v45  ;;  %v827_v63 = vadd.f32 %v826_v53, %v3098_v50  ;;  %v454_v50 = vsel %vm110_vm1, %v453_v59, %v339_v51  ;;  %v475_v45 = vrot.slane %v348_v18, 7  ;;  %v357_v53 = vld [vmem:[%s3719_s1 + $0x15] sm:$0x1]  ;;  %v359_v18 = vld [vmem:[%s3719_s1 + $0x25] sm:$0x1] }
 0x1b2   :  { %v2341_v10 = vpop.f32.mrf.mxu1  ;;  %v456_v25 = vsel %vm113_vm2, %v455_v1, %v454_v50  ;;  %v479_v51 = vrot.slane %v350_v28, 5  ;;  %v461_v1 = vrot.slane %v344_v31, 3  ;;  %v499_v19 = vrot.slane %v357_v53, 6  ;;  %v360_v31 = vld [vmem:[%s3719_s1 + $0x2d] sm:$0x1] }
 0x1b3   :  { %v3239_v22 = vadd.f32 %v2037_v42, %v2029_v61  ;;  %v838_v23 = vsub.f32 %v827_v63, %v2977_v47  ;;  %v458_v32 = vsel %vm116_vm3, %v457_v8, %v456_v25  ;;  %v351_v42 = vld [vmem:[%s3719_s1 + $0x24] sm:$0x1]  ;;  %v3295_v61 = vld [vmem:[%s3719_s1 + $0x34] sm:$0x1]  ;;  %v476_v63 = vsel %vm110_vm1, %v475_v45, %v347_v33  ;;  %v366_v45 = vld [vmem:[%s3719_s1 + $0x1e] sm:$0x1] }
 0x1b4   :  { %v460_v59 = vsel %vm119_vm4, %v459_v26, %v458_v32  ;;  %v478_v7 = vsel %vm113_vm2, %v477_v46, %v476_v63  ;;  %v481_v8 = vrot.slane %v351_v42, 4  ;;  %v1220_v10 = vsel %vm692_vm9, %v2732_v5, 0.0  ;;  %v364_v32 = vld [vmem:[%s3719_s1 + $0xe] sm:$0x1]  ;;  %v365_v42 = vld [vmem:[%s3719_s1 + $0x16] sm:$0x1] }
 0x1b5   :  { %v2363_v35 = vpop.f32.mrf.mxu1  ;;  %v2030_v58 = vmul.f32 %v838_v23, %v838_v23  ;;  %v480_v50 = vsel %vm116_vm3, %v479_v51, %v478_v7  ;;  %2409 = vmatprep.mubr.msk.f32.mxu1 %vm1234_vm12, %v1220_v10  ;;  %v497_v5 = vrot.slane %v356_v15, 7  ;;  %v501_v23 = vrot.slane %v358_v56, 5  ;;  %v3343_v15 = vld [vmem:[%s3719_s1 + $0x35] sm:$0x1]  ;;  %v363_v51 = vld [vmem:[%s3719_s1 + $0x6] sm:$0x1] }
 0x1b6   :  { %1228 = vrot.lane.b32.xlu0 %v2363_v35, %s2564_s17  ;;  %v442_v25 = vsel %vm125_vm6, %v441_v30, %v440_v0  ;;  %v463_v26 = vrot.slane %v3265_v40, 2  ;;  %v465_v28 = vrot.slane %v3270_v41, 1  ;;  %v462_v33 = vsel %vm122_vm5, %v461_v1, %v460_v59  ;;  %v367_v53 = vld [vmem:[%s3719_s1 + $0x26] sm:$0x1] }
 0x1b7   :  { %v992_v14 = vpop.f32.mrf.mxu1  ;;  %v483_v30 = vrot.slane %v352_v55, 3  ;;  %v485_v35 = vrot.slane %v3295_v61, 2  ;;  %v498_v40 = vsel %vm110_vm1, %v497_v5, %v355_v11  ;;  %v482_v46 = vsel %vm119_vm4, %v481_v8, %v480_v50  ;;  %v368_v61 = vld [vmem:[%s3719_s1 + $0x2e] sm:$0x1]  ;;  %v372_v11 = vld [vmem:[%s3719_s1 + $0xf] sm:$0x1] }
 0x1b8   :  { %v500_v34 = vsel %vm113_vm2, %v499_v19, %v498_v40  ;;  %v503_v0 = vrot.slane %v359_v18, 4  ;;  %v3353_v56 = vadd.f32 %v3239_v22, %v2030_v58  ;;  %v505_v55 = vrot.slane %v360_v31, 3  ;;  %v374_v19 = vld [vmem:[%s3719_s1 + $0x1f] sm:$0x1]  ;;  %v371_v31 = vld [vmem:[%s3719_s1 + $0x7] sm:$0x1] }
 0x1b9   :  { %v502_v1 = vsel %vm116_vm3, %v501_v23, %v500_v34  ;;  %v519_v63 = vrot.slane %v364_v32, 7  ;;  %v521_v7 = vrot.slane %v365_v42, 6  ;;  %v422_v22 = vsel %vm128_vm7, %v421_v29, %v420_v24  ;;  %v375_v23 = vld [vmem:[%s3719_s1 + $0x27] sm:$0x1]  ;;  %v376_v32 = vld [vmem:[%s3719_s1 + $0x2f] sm:$0x1] }
 0x1ba   :  { %1226 = vrot.lane.b32.xlu0 %v992_v14, %s2564_s17  ;;  %v523_v58 = vrot.slane %v366_v45, 5  ;;  %v525_v10 = vrot.slane %v367_v53, 4  ;;  %v373_v14 = vld [vmem:[%s3719_s1 + $0x17] sm:$0x1]  ;;  %v444_v18 = vsel %vm128_vm7, %v443_v49, %v442_v25  ;;  %v464_v5 = vsel %vm125_vm6, %v463_v26, %v462_v33  ;;  %v362_v45 = vld [vmem:[%s3719_s1 + $0x3d] sm:$0x1] }
 0x1bb   :  { %v520_v29 = vsel %vm110_vm1, %v519_v63, %v363_v51  ;;  %v487_v49 = vrot.slane %v3329_v6, 1  ;;  %v504_v24 = vsel %vm119_vm4, %v503_v0, %v502_v1  ;;  %v527_v26 = vrot.slane %v368_v61, 3 }
 0x1bc   :  { %v522_v25 = vsel %vm113_vm2, %v521_v7, %v520_v29  ;;  %v507_v33 = vrot.slane %v3343_v15, 2  ;;  %v543_v40 = vrot.slane %v373_v14, 6  ;;  %v547_v34 = vrot.slane %v375_v23, 4  ;;  %v370_v15 = vld [vmem:[%s3719_s1 + $0x3e] sm:$0x1]  ;;  %v3508_v29 = vld [vmem:[%s3720_s2 + $0x48] sm:$0xff] }
 0x1bd   :  { %v1143_v59 = vpop.f32.mrf.mxu1  ;;  %v524_v6 = vsel %vm116_vm3, %v523_v58, %v522_v25  ;;  %v529_v0 = vrot.slane %v369_v2, 2  ;;  %v549_v51 = vrot.slane %v376_v32, 3  ;;  %v466_v1 = vsel %vm128_vm7, %v465_v28, %v464_v5  ;;  %v3495_v2 = vld [vmem:[%s3720_s2 + $0x50] sm:$0xff]  ;;  %v3523_v23 = vld [vmem:[%s3720_s2 + $0x40] sm:$0xff] }
 0x1be   :  { %v1144_v8 = vadd.f32 %v1143_v59, %v3307_v16  ;;  %1585 = vrot.lane.b32.xlu0 %v2685_v44, %s2564_s17  ;;  %v484_v44 = vsel %vm122_vm5, %v483_v30, %v482_v46  ;;  %v541_v30 = vrot.slane %v372_v11, 7  ;;  %v545_v46 = vrot.slane %v374_v19, 5 }
 0x1bf   :  { %v2385_v50 = vpop.f32.mrf.mxu1  ;;  %v486_v42 = vsel %vm125_vm6, %v485_v35, %v484_v44  ;;  %v509_v61 = vrot.slane %v362_v45, 1  ;;  %v3482_v44 = vld [vmem:[%s3720_s2 + $0x58] sm:$0xff]  ;;  %v1221_v19 = vsel %vm692_vm9, %v3508_v29, 0.0  ;;  %s2565_s2 = smov 48  }
 0x1c0   :  { %2395 = vmatmul.mubr.msk.f32.vlgmr.msra.gmra.mxu0 %vm692_vm9, %v1144_v8  ;;  %v542_v35 = vsel %vm110_vm1, %v541_v30, %v371_v31  ;;  %v531_v8 = vrot.slane %v370_v15, 1 }
 0x1c1   :  { %2419 = vmatpush3.msk.msra.mxu0 %vm1379_vm10, %v3147_v48  ;;  %2420 = vmatprep.mubr.msk.f32.mxu0 %vm1362_vm11, %v3260_v38  ;;  %v526_v48 = vsel %vm119_vm4, %v525_v10, %v524_v6  ;;  %v506_v38 = vsel %vm122_vm5, %v505_v55, %v504_v24  ;;  %v544_v59 = vsel %vm113_vm2, %v543_v40, %v542_v35  ;;  %v1223_v24 = vsel %vm692_vm9, %v3482_v44, 0.0 }
 0x1c2   :  { %1973 = vrot.lane.b32.xlu0 %v2791_v36, %s2564_s17  ;;  %v377_v36 = vld [vmem:[%s3719_s1 + $0x37] sm:$0x1]  ;;  %v528_v53 = vsel %vm122_vm5, %v527_v26, %v526_v48  ;;  %v488_v55 = vsel %vm128_vm7, %v487_v49, %v486_v42  ;;  %v546_v63 = vsel %vm116_vm3, %v545_v46, %v544_v59  ;;  %v508_v7 = vsel %vm125_vm6, %v507_v33, %v506_v38 }
 0x1c3   :  { %v548_v58 = vsel %vm119_vm4, %v547_v34, %v546_v63  ;;  %v551_v41 = vrot.slane %v377_v36, 2  ;;  %v530_v28 = vsel %vm125_vm6, %v529_v0, %v528_v53  ;;  %v1222_v49 = vsel %vm692_vm9, %v3495_v2, 0.0 }
 0x1c4   :  { %2421 = vmatmul.mubr.msk.f32.vlgmr.msra.gmra.mxu0 %vm1362_vm11, %v422_v22  ;;  %v378_v22 = vld [vmem:[%s3719_s1 + $0x3f] sm:$0x1]  ;;  %v550_v10 = vsel %vm122_vm5, %v549_v51, %v548_v58  ;;  %v532_v14 = vsel %vm128_vm7, %v531_v8, %v530_v28  ;;  %v2046_v6 = vmul.f32 0.00086805556, %v3353_v56 }
 0x1c5   :  { %2423 = vmatprep.mubr.msk.f32.mxu0 %vm1362_vm11, %v444_v18  ;;  %v553_v11 = vrot.slane %v378_v22, 1  ;;  %v552_v50 = vsel %vm125_vm6, %v551_v41, %v550_v10 }
 0x1c6   :  { %1987 = vrot.lane.b32.xlu0 %v2867_v27, %s2564_s17  ;;  %v510_v27 = vsel %vm128_vm7, %v509_v61, %v508_v7 }
 0x1c7   :  { %v554_v18 = vsel %vm128_vm7, %v553_v11, %v552_v50 }
 0x1c8   :  { %2424 = vmatmul.mubr.msk.f32.gmra.mxu0 %vm1362_vm11, %v466_v1 }
 0x1c9   :  { %2426 = vmatprep.mubr.msk.f32.mxu0 %vm1362_vm11, %v488_v55 }
 0x1ca   :  { %2001 = vrot.lane.b32.xlu0 %v2941_v20, %s2564_s17 }
 0x1cc   :  { %2427 = vmatmul.mubr.msk.f32.gmra.mxu0 %vm1362_vm11, %v510_v27 }
 0x1cd   :  { %2429 = vmatprep.mubr.msk.f32.mxu0 %vm1362_vm11, %v532_v14 }
 0x1ce   :  { %2015 = vrot.lane.b32.xlu0 %v2977_v47, %s2564_s17 }
 0x1d0   :  { %2430 = vmatmul.mubr.msk.f32.gmra.mxu0 %vm1362_vm11, %v554_v18 }
 0x228   :  { %v3451_v20 = vpop.permute.xlu0 %1228 }
 0x229   :  { %2397 = vmatprep.subr.msk.mxu1 %vm3447_vm13, %v3451_v20  ;;  %2432 = vmatprep.subr.msk.mxu0 %vm3447_vm13, %v3451_v20  ;;  %v1233_v26 = vsel %vm692_vm9, 0.0, %v3451_v20 }
 0x22a   :  { %2398 = vmatpush3.msk.msra.mxu1 %vm3447_vm13, %v3451_v20  ;;  %2433 = vmatpush3.msk.msra.mxu0 %vm3447_vm13, %v3451_v20 }
 0x22c   :  { %v3465_v47 = vpop.permute.xlu0 %1226 }
 0x22d   :  { %2399 = vmatprep.subr.msk.mxu1 %vm3447_vm13, %v3465_v47  ;;  %2434 = vmatprep.subr.msk.mxu0 %vm3447_vm13, %v3465_v47  ;;  %v1232_v25 = vsel %vm692_vm9, 0.0, %v3465_v47 }
 0x22e   :  { %2400 = vmatpush3.msk.msra.mxu1 %vm3447_vm13, %v3465_v47  ;;  %2435 = vmatpush3.msk.msra.mxu0 %vm3447_vm13, %v3465_v47 }
 0x22f   :  { %2401 = vmatprep.subr.msk.mxu1 %vm692_vm9, %v3482_v44  ;;  %2436 = vmatprep.subr.msk.mxu0 %vm692_vm9, %v3482_v44 }
 0x230   :  { %2402 = vmatpush3.msk.msra.mxu1 %vm692_vm9, %v3482_v44  ;;  %2437 = vmatpush3.msk.msra.mxu0 %vm692_vm9, %v3482_v44  ;;  %v1586_v59 = vpop.permute.xlu0 %1585 }
 0x231   :  { %2403 = vmatprep.subr.msk.mxu1 %vm692_vm9, %v3495_v2  ;;  %2438 = vmatprep.subr.msk.mxu0 %vm692_vm9, %v3495_v2  ;;  %v1588_v1 = vsel %vm692_vm9, %v3024_v57, %v1586_v59 }
 0x232   :  { %2404 = vmatpush3.msk.msra.mxu1 %vm692_vm9, %v3495_v2  ;;  %2439 = vmatpush3.msk.msra.mxu0 %vm692_vm9, %v3495_v2 }
 0x233   :  { %2405 = vmatprep.subr.msk.mxu1 %vm692_vm9, %v3508_v29  ;;  %2440 = vmatprep.subr.msk.mxu0 %vm692_vm9, %v3508_v29 }
 0x234   :  { %2406 = vmatpush3.msk.msra.mxu1 %vm692_vm9, %v3508_v29  ;;  %2441 = vmatpush3.msk.msra.mxu0 %vm692_vm9, %v3508_v29 }
 0x235   :  { %2407 = vmatprep.subr.msk.mxu1 %vm692_vm9, %v3523_v23  ;;  %2442 = vmatprep.subr.msk.mxu0 %vm692_vm9, %v3523_v23 }
 0x236   :  { %2408 = vmatpush3.msk.msra.mxu1 %vm692_vm9, %v3523_v23  ;;  %2443 = vmatpush3.msk.msra.mxu0 %vm692_vm9, %v3523_v23 }
 0x237   :  { %2410 = vmatmul.mubr.msk.f32.vlgmr.msra.gmra.mxu1 %vm1234_vm12, %v1221_v19  ;;  %2450 = vmatprep.subr.mxu1 %v2562_v3 }
 0x238   :  { %2412 = vmatprep.mubr.msk.f32.mxu1 %vm1234_vm12, %v1222_v49  ;;  %2465 = vmatprep.subr.mxu0 %v2562_v3 }
 0x23b   :  { %2413 = vmatmul.mubr.msk.f32.gmra.mxu1 %vm1234_vm12, %v1223_v24  ;;  %v1974_v24 = vpop.permute.xlu0 %1973 }
 0x23c   :  { %2415 = vmatprep.mubr.msk.f32.mxu1 %vm1234_vm12, %v1232_v25 }
 0x23f   :  { %2416 = vmatmul.mubr.msk.f32.gmra.mxu1 %vm1234_vm12, %v1233_v26 }
 0x240   :  { %2462 = vmatprep.mubr.msk.f32.mxu1 %vm2563_vm0, %v2562_v3 }
 0x280   :  { %v1216_v31 = vpop.f32.mrf.mxu0 }
 0x281   :  { %v1217_v32 = vadd.f32 %v1216_v31, %v3094_v37 }
 0x282   :  { %v2396_v33 = vpop.f32.mrf.mxu0 }
 0x283   :  { %1354 = vrot.lane.b32.xlu1 %v1217_v32, %s2564_s17  ;;  %v1976_v32 = vsel %vm692_vm9, %v3032_v60, %v1974_v24  ;;  %v1988_v33 = vpop.permute.xlu0 %1987 }
 0x284   :  { %v3561_v37 = vpop.f32.mrf.mxu0 }
 0x286   :  { %v1449_v30 = vpop.f32.mrf.mxu0 }
 0x287   :  { %1966 = vrot.lane.b32.xlu1 %v2750_v13, %s2564_s17 }
 0x288   :  { %v3563_v40 = vpop.f32.mrf.mxu0 }
 0x28a   :  { %v1459_v42 = vpop.f32.mrf.mxu0 }
 0x28b   :  { %1980 = vrot.lane.b32.xlu1 %v2830_v62, %s2564_s17 }
 0x28c   :  { %v3565_v13 = vpop.f32.mrf.mxu0 }
 0x28e   :  { %v1469_v45 = vpop.f32.mrf.mxu0 }
 0x28f   :  { %1994 = vrot.lane.b32.xlu1 %v2904_v54, %s2564_s17 }
 0x290   :  { %v2431_v48 = vpop.f32.mrf.mxu0 }
 0x292   :  { %v1479_v0 = vpop.f32.mrf.mxu0 }
 0x293   :  { %2008 = vrot.lane.b32.xlu1 %v2966_v39, %s2564_s17  ;;  %s2567_s17 = smov [#allocation2]  }
 0x294   :  { %s2072_s22 = sshll.u32 %s2567_s17, 4  ;;  %s2073_s22 = int_to_ptr.vmem [resolvable:$true] %s2072_s22 }
 0x295   :  { %s2540_s24 = scalar_lea.vmem %s2073_s22, 16  ;;  %s2544_s25 = scalar_lea.vmem %s2073_s22, 32 }
 0x296   :  { %p2541_p0 = scmp.ne.s32.totalorder %s2073_s22, %s2540_s24  ;;  %p2545_p1 = scmp.lt.s32.totalorder %s2073_s22, %s2073_s22 }
 0x297   :  { %2048 = vrot.lane.b32.xlu1 %v2046_v6, %s2565_s2  ;;  %p2546_p2 = scmp.lt.s32.totalorder %s2544_s25, %s2540_s24 }
 0x299   :  { %p2547_p3 = por %p2546_p2, %p2545_p1 }
 0x29b   :  { %p2548_p4 = pnand %p2547_p3, %p2541_p0 }
 0x2f5   :  { %v1355_v62 = vpop.permute.xlu1 %1354 }
 0x2f6   :  { %v1357_v54 = vsel %vm692_vm9, %v3307_v16, %v1355_v62  ;;  %v2002_v62 = vpop.permute.xlu0 %2001 }
 0x2f7   :  { %v3570_v39 = vrot.slane %v1357_v54, %v3015_v52  ;;  %v3572_v56 = vpop.f32.mrf.mxu1 }
 0x2f9   :  { %v3575_v46 = vadd.f32 %v1459_v42, %v3570_v39  ;;  %v3577_v34 = vpop.f32.mrf.mxu1  ;;  %v3580_v38 = vadd.f32 %v1469_v45, %v3570_v39  ;;  %v3583_v15 = vadd.f32 %v1449_v30, %v3570_v39  ;;  %v3592_v16 = vadd.f32 %v1479_v0, %v3570_v39  ;;  %v1967_v49 = vpop.permute.xlu1 %1966 }
 0x2fa   :  { %v1465_v55 = vadd.f32 %v3563_v40, %v3570_v39  ;;  %v1485_v8 = vadd.f32 %v2431_v48, %v3570_v39  ;;  %v1455_v41 = vadd.f32 %v3561_v37, %v3570_v39  ;;  %v1969_v25 = vsel %vm692_vm9, %v3024_v57, %v1967_v49 }
 0x2fb   :  { %v3585_v36 = vpop.f32.mrf.mxu1  ;;  %2444 = vmatprep.mubr.msk.f32.mxu0 %vm1234_vm12, %v3583_v15  ;;  %v1990_v57 = vsel %vm692_vm9, %v3046_v4, %v1988_v33 }
 0x2fc   :  { %2445 = vmatmul.mubr.msk.f32.vlgmr.msra.gmra.mxu0 %vm1234_vm12, %v3575_v46 }
 0x2fd   :  { %v3594_v35 = vpop.f32.mrf.mxu1  ;;  %2447 = vmatprep.mubr.msk.f32.mxu0 %vm1234_vm12, %v3580_v38  ;;  %v1981_v26 = vpop.permute.xlu1 %1980 }
 0x2fe   :  { %v1983_v40 = vsel %vm692_vm9, %v3039_v43, %v1981_v26 }
 0x2ff   :  { %v2417_v51 = vpop.f32.mrf.mxu1 }
 0x300   :  { %2451 = vmatpush3.msra.mxu1 %v2417_v51  ;;  %2466 = vmatpush3.msra.mxu0 %v2417_v51 }
 0x301   :  { %2448 = vmatmul.mubr.msk.f32.gmra.mxu0 %vm1234_vm12, %v3592_v16  ;;  %v1339_v53 = vpop.f32.mrf.mxu1  ;;  %2452 = vmatprep.subr.mxu1 %v2562_v3  ;;  %v1995_v42 = vpop.permute.xlu1 %1994 }
 0x302   :  { %2467 = vmatprep.subr.mxu0 %v2562_v3  ;;  %2453 = vmatpush3.msra.mxu1 %v1339_v53 }
 0x303   :  { %2468 = vmatpush3.msra.mxu0 %v1339_v53  ;;  %2454 = vmatprep.subr.mxu1 %v2562_v3 }
 0x304   :  { %2469 = vmatprep.subr.mxu0 %v2562_v3  ;;  %2455 = vmatpush3.msra.mxu1 %v3585_v36 }
 0x305   :  { %2470 = vmatpush3.msra.mxu0 %v3585_v36  ;;  %2456 = vmatprep.subr.mxu1 %v2562_v3  ;;  %v2009_v0 = vpop.permute.xlu1 %2008 }
 0x306   :  { %2471 = vmatprep.subr.mxu0 %v2562_v3  ;;  %2457 = vmatpush3.msra.mxu1 %v3594_v35 }
 0x307   :  { %2472 = vmatpush3.msra.mxu0 %v3594_v35  ;;  %2458 = vmatprep.subr.mxu1 %v2562_v3 }
 0x308   :  { %2473 = vmatprep.subr.mxu0 %v2562_v3  ;;  %2459 = vmatpush3.msra.mxu1 %v3572_v56 }
 0x309   :  { %2474 = vmatpush3.msra.mxu0 %v3572_v56  ;;  %2460 = vmatprep.subr.mxu1 %v2562_v3 }
 0x30a   :  { %2475 = vmatprep.subr.mxu0 %v2562_v3  ;;  %2461 = vmatpush3.msra.mxu1 %v3577_v34 }
 0x30b   :  { %2476 = vmatpush3.msra.mxu0 %v3577_v34  ;;  %2463 = vmatmul.mubr.msk.f32.vlgmr.msra.gmra.mxu1 %vm1234_vm12, %v1588_v1 }
 0x30c   :  { %2480 = vmatprep.subr.mxu1 %v2562_v3  ;;  %2477 = vmatprep.mubr.msk.f32.mxu0 %vm2563_vm0, %v2562_v3 }
 0x30d   :  { %2481 = vmatpush3.msra.mxu1 %v2417_v51  ;;  %2495 = vmatprep.subr.mxu0 %v2562_v3 }
 0x30e   :  { %2482 = vmatprep.subr.mxu1 %v2562_v3  ;;  %2492 = vmatprep.mubr.msk.f32.mxu1 %vm2563_vm0, %v2562_v3 }
 0x30f   :  { %2483 = vmatpush3.msra.mxu1 %v1339_v53 }
 0x310   :  { %2484 = vmatprep.subr.mxu1 %v2562_v3 }
 0x311   :  { %2485 = vmatpush3.msra.mxu1 %v3585_v36 }
 0x312   :  { %2486 = vmatprep.subr.mxu1 %v2562_v3 }
 0x313   :  { %2487 = vmatpush3.msra.mxu1 %v3594_v35 }
 0x314   :  { %2488 = vmatprep.subr.mxu1 %v2562_v3 }
 0x315   :  { %2489 = vmatpush3.msra.mxu1 %v3572_v56 }
 0x316   :  { %2490 = vmatprep.subr.mxu1 %v2562_v3 }
 0x317   :  { %2491 = vmatpush3.msra.mxu1 %v3577_v34 }
 0x318   :  { %2510 = vmatprep.subr.msk.mxu1 %vm3447_vm13, %v3451_v20 }
 0x3bc   :  { %v2446_v61 = vpop.f32.mrf.mxu0 }
 0x3bd   :  { %v1572_v63 = vadd.f32 %v2446_v61, %v1465_v55  ;;  %v2011_v61 = vsel %vm692_vm9, %v3064_v17, %v2009_v0 }
 0x3be   :  { %v1566_v7 = vpop.f32.mrf.mxu0 }
 0x3bf   :  { %v1567_v28 = vadd.f32 %v1566_v7, %v1455_v41  ;;  %v2566_v41 = vmov 0.0009765625  }
 0x3c1   :  { %v2449_v22 = vpop.f32.mrf.mxu0 }
 0x3c2   :  { %v3642_v58 = vadd.f32 %v2449_v22, %v1485_v8 }
 0x3c3   :  { %v1576_v14 = vpop.f32.mrf.mxu0 }
 0x3cb   :  { %v1658_v10 = vpop.f32.mrf.mxu1 }
 0x3cc   :  { %v1659_v27 = vadd.f32 %v1658_v10, %v1567_v28 }
 0x3cd   :  { %v2464_v11 = vpop.f32.mrf.mxu1 }
 0x3ce   :  { %2478 = vmatmul.mubr.msk.f32.vlgmr.msra.gmra.mxu0 %vm1234_vm12, %v1659_v27  ;;  %v1977_v6 = vsub.f32 %v1659_v27, %v1976_v32 }
 0x3cf   :  { %2496 = vmatpush3.msra.mxu0 %v2417_v51  ;;  %2507 = vmatprep.mubr.msk.f32.mxu0 %vm2563_vm0, %v2562_v3  ;;  %v1997_v51 = vsel %vm692_vm9, %v3052_v9, %v1995_v42  ;;  %v2040_v9 = vsel %vm692_vm9, 4.8828126e-05, %v2566_v41 }
 0x3d0   :  { %2497 = vmatprep.subr.mxu0 %v2562_v3  ;;  %v2044_v11 = vrot.slane %v2040_v9, %v3015_v52 }
 0x3d1   :  { %2498 = vmatpush3.msra.mxu0 %v1339_v53  ;;  %v2016_v53 = vpop.permute.xlu0 %2015 }
 0x3d2   :  { %2499 = vmatprep.subr.mxu0 %v2562_v3 }
 0x3d3   :  { %2500 = vmatpush3.msra.mxu0 %v3585_v36 }
 0x3d4   :  { %2501 = vmatprep.subr.mxu0 %v2562_v3 }
 0x3d5   :  { %2502 = vmatpush3.msra.mxu0 %v3594_v35  ;;  %v2004_v35 = vsel %vm692_vm9, %v3058_v12, %v2002_v62 }
 0x3d6   :  { %2503 = vmatprep.subr.mxu0 %v2562_v3 }
 0x3d7   :  { %2504 = vmatpush3.msra.mxu0 %v3572_v56 }
 0x3d8   :  { %2505 = vmatprep.subr.mxu0 %v2562_v3  ;;  %v1475_v3 = vadd.f32 %v3565_v13, %v3570_v39  ;;  %v1978_v13 = vmul.f32 %v1977_v6, %v1977_v6 }
 0x3d9   :  { %2506 = vmatpush3.msra.mxu0 %v3577_v34 }
 0x3da   :  { %v1577_v5 = vadd.f32 %v1576_v14, %v1475_v3 }
 0x48e   :  { %v1731_v50 = vpop.f32.mrf.mxu0 }
 0x48f   :  { %v1732_v18 = vadd.f32 %v1731_v50, %v1572_v63  ;;  %v2049_v50 = vpop.permute.xlu1 %2048 }
 0x490   :  { %v2479_v19 = vpop.f32.mrf.mxu0 }
 0x491   :  { %2493 = vmatmul.mubr.msk.f32.vlgmr.msra.gmra.mxu1 %vm1234_vm12, %v1732_v18  ;;  %v1991_v56 = vsub.f32 %v1732_v18, %v1990_v57 }
 0x492   :  { %2511 = vmatpush3.msk.msra.mxu1 %vm3447_vm13, %v3451_v20  ;;  %2522 = vmatprep.mubr.msk.f32.mxu1 %vm1234_vm12, %v1588_v1 }
 0x493   :  { %2512 = vmatprep.subr.msk.mxu1 %vm3447_vm13, %v3465_v47  ;;  %v1992_v4 = vmul.f32 %v1991_v56, %v1991_v56 }
 0x494   :  { %2513 = vmatpush3.msk.msra.mxu1 %vm3447_vm13, %v3465_v47 }
 0x495   :  { %2514 = vmatprep.subr.msk.mxu1 %vm692_vm9, %v3482_v44 }
 0x496   :  { %2515 = vmatpush3.msk.msra.mxu1 %vm692_vm9, %v3482_v44 }
 0x497   :  { %2516 = vmatprep.subr.msk.mxu1 %vm692_vm9, %v3495_v2 }
 0x498   :  { %2517 = vmatpush3.msk.msra.mxu1 %vm692_vm9, %v3495_v2 }
 0x499   :  { %2518 = vmatprep.subr.msk.mxu1 %vm692_vm9, %v3508_v29 }
 0x49a   :  { %2519 = vmatpush3.msk.msra.mxu1 %vm692_vm9, %v3508_v29 }
 0x49b   :  { %2520 = vmatprep.subr.msk.mxu1 %vm692_vm9, %v3523_v23 }
 0x49c   :  { %2521 = vmatpush3.msk.msra.mxu1 %vm692_vm9, %v3523_v23 }
 0x49d   :  { %2523 = vmatmul.mubr.msk.f32.vlgmr.msra.gmra.mxu1 %vm1234_vm12, %v1659_v27 }
 0x49e   :  { %2525 = vmatprep.mubr.msk.f32.mxu1 %vm1234_vm12, %v1732_v18 }
 0x551   :  { %v1804_v20 = vpop.f32.mrf.mxu1 }
 0x552   :  { %v1805_v47 = vadd.f32 %v1804_v20, %v1577_v5 }
 0x553   :  { %v2494_v44 = vpop.f32.mrf.mxu1 }
 0x554   :  { %2508 = vmatmul.mubr.msk.f32.vlgmr.msra.gmra.mxu0 %vm1234_vm12, %v1805_v47  ;;  %2526 = vmatmul.mubr.msk.f32.gmra.mxu1 %vm1234_vm12, %v1805_v47  ;;  %v2005_v59 = vsub.f32 %v1805_v47, %v2004_v35 }
 0x556   :  { %v2006_v8 = vmul.f32 %v2005_v59, %v2005_v59 }
 0x55d   :  { %v2524_v2 = vpop.f32.mrf.mxu1 }
 0x55e   :  { %v1953_v37 = vadd.f32 %v2524_v2, %v3575_v46 }
 0x55f   :  { %v1947_v29 = vpop.f32.mrf.mxu1 }
 0x560   :  { %v1948_v23 = vadd.f32 %v1947_v29, %v3583_v15  ;;  %v1984_v45 = vsub.f32 %v1953_v37, %v1983_v40 }
 0x562   :  { %v1970_v31 = vsub.f32 %v1948_v23, %v1969_v25  ;;  %v1985_v60 = vmul.f32 %v1984_v45, %v1984_v45 }
 0x564   :  { %v1971_v30 = vmul.f32 %v1970_v31, %v1970_v31 }
 0x566   :  { %v1979_v54 = vadd.f32 %v1978_v13, %v1971_v30 }
 0x568   :  { %v1986_v46 = vadd.f32 %v1985_v60, %v1979_v54 }
 0x56a   :  { %v1993_v7 = vadd.f32 %v1992_v4, %v1986_v46 }
 0x614   :  { %v1877_v48 = vpop.f32.mrf.mxu0  ;;  %v2527_v39 = vpop.f32.mrf.mxu1 }
 0x615   :  { %v1963_v36 = vadd.f32 %v2527_v39, %v3592_v16  ;;  %v1878_v1 = vadd.f32 %v1877_v48, %v3642_v58 }
 0x616   :  { %v2509_v34 = vpop.f32.mrf.mxu0  ;;  %v1957_v15 = vpop.f32.mrf.mxu1 }
 0x617   :  { %v1958_v43 = vadd.f32 %v1957_v15, %v3580_v38  ;;  %v2012_v63 = vsub.f32 %v1963_v36, %v2011_v61  ;;  %v2018_v38 = vsel %vm692_vm9, %v3070_v21, %v2016_v53 }
 0x618   :  { %v2019_v12 = vsub.f32 %v1878_v1, %v2018_v38 }
 0x619   :  { %v1998_v55 = vsub.f32 %v1958_v43, %v1997_v51  ;;  %v2013_v28 = vmul.f32 %v2012_v63, %v2012_v63 }
 0x61a   :  { %v2020_v27 = vmul.f32 %v2019_v12, %v2019_v12 }
 0x61b   :  { %v1999_v16 = vmul.f32 %v1998_v55, %v1998_v55 }
 0x61d   :  { %v2000_v22 = vadd.f32 %v1999_v16, %v1993_v7 }
 0x61f   :  { %v2007_v10 = vadd.f32 %v2006_v8, %v2000_v22 }
 0x621   :  { %v2014_v58 = vadd.f32 %v2013_v28, %v2007_v10 }
 0x623   :  { %v2021_v14 = vadd.f32 %v2020_v27, %v2014_v58 }
 0x625   :  { %v2045_v17 = vmul.f32 %v2044_v11, %v2021_v14 }
 0x627   :  { %v2051_v18 = vsel %vm1234_vm12, %v2045_v17, %v2049_v50 }
 0x628   :  { %v2053_v19 = vsel %vm2052_vm14, %v2051_v18, 0.0 }
 0x629   :  { %2054 = vadd.xlane.f32.xlu0 %v2053_v19 }
 0x6b2   :  { %v2055_v21 = vpop.xlane.xlu0 %2054 }
 0x6b3   :  { %v2056_v3 = vrot.slane %v2055_v21, 4 }
 0x6b5   :  { %v2057_v5 = vadd.f32 %v2056_v3, %v2055_v21 }
 0x6b7   :  { %v2058_v20 = vrot.slane %v2057_v5, 2 }
 0x6b9   :  { %v2059_v47 = vadd.f32 %v2058_v20, %v2057_v5 }
 0x6bb   :  { %v2060_v44 = vrot.slane %v2059_v47, 1 }
 0x6bd   :  { %v2061_v2 = vadd.f32 %v2060_v44, %v2059_v47 }
 0x6bf   :  { %2528 = vpush %v2061_v2 }
 0x6f0   :  { %s2529_s23 = spop %2528 }
 0x6f1   :  { %v2063_v52 = vstv %s2529_s23 }
 0x6f2   :  { %2065 = vst.msk [vmem:[#allocation2] sm:$0x1] %vm2064_vm15, %v2063_v52 }
 0x6f3   :  { %2551 = shalt.err (!%p2548_p4)
}
 0x6f4   :  { %2075 = dma.vmem_to_hbm [thread:$0]  %s2073_s22, 16, %s3721_s3, [#allocation3]  }
 0x6f5   :  { %2560 = dma.done.wait [#allocation3], 16  }
 0x6f6   :  { %2561 = vsyncadd [#allocation3], 4294967280 }
 0x6f7   :  { %2079 = vsyncpa [#allocation3], 1 }

</bundles_post_ra>
